<compile_context>
chip_gen: v5e
topology: v5e:2x2
jax: 0.10.0
libtpu: 0.0.40
codegen_flags: <defaults>
</compile_context>

<pallas_src>
import functools

import jax
import jax.numpy as jnp
from jax import lax
from jax.experimental import pallas as pl
from jax.experimental.pallas import tpu as pltpu


def _round_up(x, m):
    return ((x + m - 1) // m) * m


def _vmem_budget_bytes():
    """Generation-aware scoped-VMEM budget: 75% of physical capacity."""
    cap = None
    try:
        cap = getattr(pltpu.get_tpu_info(), "vmem_capacity_bytes", None)
    except Exception:
        cap = None
    if not cap:
        cap = 64 * 1024 * 1024  # conservative fallback (v7x physical per-TC VMEM)
    return int(0.75 * cap)


def _skipgram_kernel(emb_ref, w_ref, b_ref, out_ref, e_ref, *,
                     max_norm, w_resident):
    # emb_ref: (TB, Dp) gathered embedding rows, f32 (zero-padded along D)
    # w_ref  : (nv, Dp, TV) resident W^T slabs  OR  (1, Dp, TV) streamed slab, bf16
    # b_ref  : (1, TV) bias tile, f32
    # out_ref: (TB, TV) output tile (bf16 by default)
    # e_ref  : (TB, Dp) VMEM scratch holding the renormed rows in compute dtype
    j = pl.program_id(1)

    # nn.Embedding(max_norm=...): rescale rows whose L2 norm exceeds max_norm.
    # Computed once per batch tile (j == 0) and kept resident for the V sweep.
    # Matches PyTorch's max_norm / (norm + 1e-7) formula in f32.
    @pl.when(j == 0)
    def _():
        e = emb_ref[...].astype(jnp.float32)
        norm = jnp.sqrt(jnp.sum(e * e, axis=-1, keepdims=True))
        scale = jnp.where(norm > max_norm, max_norm / (norm + 1e-7), 1.0)
        e_ref[...] = (e * scale).astype(e_ref.dtype)

    # Pick the j-th (Dp, TV) slab of W^T (resident) or the streamed slab.
    w_tile = w_ref[j] if w_resident else w_ref[0]

    # Linear: y = e @ W^T + b  (bf16 operands, f32 accumulation on the MXU).
    y = jnp.dot(e_ref[...], w_tile, preferred_element_type=jnp.float32)
    out_ref[...] = (y + b_ref[...].astype(jnp.float32)).astype(out_ref.dtype)


def skipgram_forward(ids, emb_table, w, b, *, max_norm,
                     batch_tile=256, vocab_tile=1024,
                     out_dtype=jnp.bfloat16, compute_dtype=jnp.bfloat16):
    """SkipGram forward pass.

    ids       : [B]    int32 token ids
    emb_table : [V, D] nn.Embedding.weight
    w         : [V, D] nn.Linear.weight
    b         : [V]    nn.Linear.bias
    returns   : [B, V] logits in out_dtype (bf16 default: halves output HBM
                traffic; pass jnp.float32 for exact-parity use cases)
    """
    B = ids.shape[0]
    V, D = emb_table.shape
    assert w.shape == (V, D) and b.shape == (V,)

    vmem_limit = _vmem_budget_bytes()
    cbytes = jnp.dtype(compute_dtype).itemsize
    obytes = jnp.dtype(out_dtype).itemsize

    Dp = _round_up(D, 16)  # bf16 sublane packing friendly

    # ---- batch tile: sublane multiple; prefer >= 2 blocks along the
    #      'parallel' batch axis so both v7x TensorCores get work ------------
    tb = _round_up(min(batch_tile, B), 8)
    if _round_up(B, tb) // tb < 2 and tb >= 16:
        tb = _round_up(tb // 2, 8)
    Bp = _round_up(B, tb)

    # ---- vocab tile: as large as the VMEM budget allows (lane-dense) -------
    tv = max(128, min(_round_up(vocab_tile, 128), _round_up(V, 128)))
    while True:
        Vp = _round_up(V, tv)
        nv = Vp // tv
        w_bytes = Dp * Vp * cbytes
        # Hold the whole W^T resident if (double-buffered) it uses at most
        # half of the budget; this removes all W re-streaming across B tiles.
        w_resident = (2 * w_bytes) <= (vmem_limit // 2)
        footprint = (2 * tb * Dp * 4                      # gathered rows (f32, 2 bufs)
                     + tb * Dp * cbytes                   # renormed scratch
                     + (2 * w_bytes if w_resident else 2 * Dp * tv * cbytes)
                     + 2 * tv * 4                         # bias tiles
                     + 2 * tb * tv * obytes)              # output tiles
        if footprint <= vmem_limit or tv == 128:
            break
        tv = max(128, ((tv // 2) // 128) * 128)

    # ---- glue: gather + zero-pad; repack W^T once as (nv, Dp, tv) bf16 -----
    ids_p = jnp.pad(ids, (0, Bp - B)).astype(jnp.int32)
    gathered = jnp.take(emb_table, ids_p, axis=0).astype(jnp.float32)   # [Bp, D]
    gathered = jnp.pad(gathered, ((0, 0), (0, Dp - D)))                 # [Bp, Dp]
    # (gathered stays f32: it is a tiny stream and keeps the norm exact.)
    w_p = jnp.pad(w, ((0, Vp - V), (0, Dp - D))).astype(compute_dtype)  # [Vp, Dp]
    w_r = jnp.swapaxes(w_p.reshape(nv, tv, Dp), 1, 2)                   # [nv, Dp, tv]
    bias = jnp.pad(b, (0, Vp - V)).astype(jnp.float32).reshape(1, Vp)   # [1, Vp]

    grid = (Bp // tb, nv)

    if w_resident:
        w_spec = pl.BlockSpec((nv, Dp, tv), lambda i, j: (0, 0, 0))
    else:
        w_spec = pl.BlockSpec((1, Dp, tv), lambda i, j: (j, 0, 0))

    kernel = functools.partial(_skipgram_kernel, max_norm=float(max_norm),
                               w_resident=w_resident)

    out_padded = pl.pallas_call(
        kernel,
        out_shape=jax.ShapeDtypeStruct((Bp, Vp), out_dtype),
        grid_spec=pltpu.PrefetchScalarGridSpec(
            num_scalar_prefetch=0,
            grid=grid,
            in_specs=[
                # gathered rows: block index constant across the inner V sweep
                pl.BlockSpec((tb, Dp), lambda i, j: (i, 0)),
                # W^T: resident (DMA'd once) or streamed per vocab tile
                w_spec,
                # bias tile
                pl.BlockSpec((1, tv), lambda i, j: (0, j)),
            ],
            out_specs=pl.BlockSpec((tb, tv), lambda i, j: (i, j)),
            scratch_shapes=[pltpu.VMEM((tb, Dp), compute_dtype)],
        ),
        compiler_params=pltpu.CompilerParams(
            # batch axis parallel (v7x megacore); vocab axis arbitrary because
            # the renorm scratch carries state across the V sweep.
            dimension_semantics=("parallel", "arbitrary"),
            vmem_limit_bytes=int(vmem_limit),
        ),
    )(gathered, w_r, bias)

    return out_padded[:B, :V]


def _reference(ids, emb_table, w, b, max_norm):
    e = jnp.take(emb_table, ids, axis=0)
    n = jnp.linalg.norm(e, axis=-1, keepdims=True)
    e = e * jnp.where(n > max_norm, max_norm / (n + 1e-7), 1.0)
    return jnp.dot(e, w.T, precision=lax.Precision.HIGHEST) + b[None, :]


if __name__ == "__main__":
    # Deterministic problem: vocab=1000 (pads to 1024), embed_dim=64, batch=256.
    vocab_size, embed_dim, max_norm = 1000, 64, 1.0
    B = 256

    key = jax.random.PRNGKey(0)
    k_emb, k_w, k_b, k_ids = jax.random.split(key, 4)

    # nn.Embedding default init: N(0, 1)
    emb_table = jax.random.normal(k_emb, (vocab_size, embed_dim), dtype=jnp.float32)
    # nn.Linear default init: U(-1/sqrt(in), 1/sqrt(in)) for weight and bias
    bound = 1.0 / (embed_dim ** 0.5)
    w = jax.random.uniform(k_w, (vocab_size, embed_dim), minval=-bound, maxval=bound,
                           dtype=jnp.float32)
    b = jax.random.uniform(k_b, (vocab_size,), minval=-bound, maxval=bound,
                           dtype=jnp.float32)

    ids = jax.random.randint(k_ids, (B,), 0, vocab_size, dtype=jnp.int32)

    out = skipgram_forward(ids, emb_table, w, b, max_norm=max_norm)
    out = jax.block_until_ready(out)

    ref = _reference(ids, emb_table, w, b, max_norm)
    assert out.shape == (B, vocab_size)

    out_f32 = out.astype(jnp.float32)
    max_err = float(jnp.max(jnp.abs(out_f32 - ref)))
    # bf16 inputs/outputs => looser tolerance than the f32 HIGHEST reference.
    assert jnp.allclose(out_f32, ref, atol=2e-2, rtol=2e-2), (
        f"mismatch vs pure-JAX reference (max abs err {max_err:.3e})")

    print("KERNEL_OK")
</pallas_src>

<mosaic_0001>
module attributes {stable_mosaic.version = 11 : i64} {
  func.func @_skipgram_kernel(%arg0: i32, %arg1: i32, %arg2: memref<128x64xf32, #tpu.memory_space<vmem>>, %arg3: memref<1x64x1024xbf16, #tpu.memory_space<vmem>>, %arg4: memref<1x1024xf32, #tpu.memory_space<vmem>>, %arg5: memref<128x1024xbf16, #tpu.memory_space<vmem>>, %arg6: memref<128x64xbf16, #tpu.memory_space<vmem>>) attributes {dimension_semantics = [#tpu.dimension_semantics<parallel>, #tpu.dimension_semantics<arbitrary>], iteration_bounds = array<i64: 2, 1>, scalar_prefetch = 0 : i64, scratch_operands = 1 : i64, tpu.core_type = #tpu.core_type<tc>, window_params = [{transform_indices = @transform_0, window_bounds = array<i64: 128, 64>}, {pipeline_mode = #tpu.pipeline_mode<synchronous>, transform_indices = @transform_1, window_bounds = array<i64: 1, 64, 1024>}, {transform_indices = @transform_2, window_bounds = array<i64: 1, 1024>}, {transform_indices = @transform_3, window_bounds = array<i64: 128, 1024>}]} {
    %c0_i32 = arith.constant 0 : i32
    %0 = arith.cmpi eq, %arg1, %c0_i32 : i32
    %1 = arith.extui %0 : i1 to i32
    %c0_i32_0 = arith.constant 0 : i32
    %2 = arith.cmpi ne, %1, %c0_i32_0 : i32
    scf.if %2 {
      %c0_8 = arith.constant 0 : index
      %c0_9 = arith.constant 0 : index
      %13 = vector.load %arg2[%c0_8, %c0_9] : memref<128x64xf32, #tpu.memory_space<vmem>>, vector<128x64xf32>
      %14 = arith.mulf %13, %13 : vector<128x64xf32>
      %cst_10 = arith.constant dense<0.000000e+00> : vector<128xf32>
      %15 = vector.multi_reduction <add>, %14, %cst_10 [1] : vector<128x64xf32> to vector<128xf32>
      %16 = vector.shape_cast %15 : vector<128xf32> to vector<128x1xf32>
      %17 = math.sqrt %16 : vector<128x1xf32>
      %cst_11 = arith.constant 1.000000e+00 : f32
      %18 = vector.broadcast %cst_11 : f32 to vector<128x1xf32>
      %19 = arith.cmpf ogt, %17, %18 : vector<128x1xf32>
      %cst_12 = arith.constant 1.000000e-07 : f32
      %20 = vector.broadcast %cst_12 : f32 to vector<128x1xf32>
      %21 = arith.addf %17, %20 : vector<128x1xf32>
      %cst_13 = arith.constant 1.000000e+00 : f32
      %22 = vector.broadcast %cst_13 : f32 to vector<128x1xf32>
      %23 = arith.divf %22, %21 : vector<128x1xf32>
      %cst_14 = arith.constant 1.000000e+00 : f32
      %24 = vector.broadcast %cst_14 : f32 to vector<128x1xf32>
      %25 = arith.select %19, %23, %24 : vector<128x1xi1>, vector<128x1xf32>
      %26 = vector.broadcast %25 : vector<128x1xf32> to vector<128x64xf32>
      %27 = arith.mulf %13, %26 : vector<128x64xf32>
      %28 = arith.truncf %27 : vector<128x64xf32> to vector<128x64xbf16>
      %c0_15 = arith.constant 0 : index
      %c0_16 = arith.constant 0 : index
      %29 = vector.load %arg6[%c0_15, %c0_16] : memref<128x64xbf16, #tpu.memory_space<vmem>>, vector<128x64xbf16>
      tpu.vector_store %arg6[%c0_15, %c0_16], %28 {strides = array<i32>} : memref<128x64xbf16, #tpu.memory_space<vmem>>, vector<128x64xbf16>,
    } else {
    }
    %3 = arith.index_cast %arg1 : i32 to index
    %c0 = arith.constant 0 : index
    %c0_1 = arith.constant 0 : index
    %4 = vector.load %arg3[%3, %c0, %c0_1] : memref<1x64x1024xbf16, #tpu.memory_space<vmem>>, vector<1x64x1024xbf16>
    %5 = vector.shape_cast %4 : vector<1x64x1024xbf16> to vector<64x1024xbf16>
    %c0_2 = arith.constant 0 : index
    %c0_3 = arith.constant 0 : index
    %6 = vector.load %arg6[%c0_2, %c0_3] : memref<128x64xbf16, #tpu.memory_space<vmem>>, vector<128x64xbf16>
    %cst = arith.constant dense<0.000000e+00> : vector<128x1024xf32>
    %7 = tpu.matmul %6, %5, %cst {dimension_numbers = #tpu.dot_dimension_numbers<[1], [0], [0], [1], [0, 0, 1, 1], [], []>} : vector<128x64xbf16>, vector<64x1024xbf16>, vector<128x1024xf32> -> vector<128x1024xf32>
    %c0_4 = arith.constant 0 : index
    %c0_5 = arith.constant 0 : index
    %8 = vector.load %arg4[%c0_4, %c0_5] : memref<1x1024xf32, #tpu.memory_space<vmem>>, vector<1x1024xf32>
    %9 = vector.broadcast %8 : vector<1x1024xf32> to vector<128x1024xf32>
    %10 = arith.addf %7, %9 : vector<128x1024xf32>
    %11 = arith.truncf %10 : vector<128x1024xf32> to vector<128x1024xbf16>
    %c0_6 = arith.constant 0 : index
    %c0_7 = arith.constant 0 : index
    %12 = vector.load %arg5[%c0_6, %c0_7] : memref<128x1024xbf16, #tpu.memory_space<vmem>>, vector<128x1024xbf16>
    tpu.vector_store %arg5[%c0_6, %c0_7], %11 {strides = array<i32>} : memref<128x1024xbf16, #tpu.memory_space<vmem>>, vector<128x1024xbf16>,
    return
  }
  func.func @transform_0(%arg0: i32, %arg1: i32) -> (i32, i32) {
    %c0_i32 = arith.constant 0 : i32
    %c0_i32_0 = arith.constant 0 : i32
    return %arg0, %c0_i32 : i32, i32
  }
  func.func @transform_1(%arg0: i32, %arg1: i32) -> (i32, i32, i32) {
    %c0_i32 = arith.constant 0 : i32
    %c0_i32_0 = arith.constant 0 : i32
    %c0_i32_1 = arith.constant 0 : i32
    %c0_i32_2 = arith.constant 0 : i32
    return %c0_i32, %c0_i32_0, %c0_i32_1 : i32, i32, i32
  }
  func.func @transform_2(%arg0: i32, %arg1: i32) -> (i32, i32) {
    %c0_i32 = arith.constant 0 : i32
    %c0_i32_0 = arith.constant 0 : i32
    return %c0_i32, %arg1 : i32, i32
  }
  func.func @transform_3(%arg0: i32, %arg1: i32) -> (i32, i32) {
    %c0_i32 = arith.constant 0 : i32
    return %arg0, %arg1 : i32, i32
  }
}

</mosaic_0001>

<bundles_post_ra>
// kernel: tpu_custom_call.1
= control target key start
LH: loop header
LB: loop body
LE: loop exit
PB: predicated region body
PF: predicated region fallthrough
CT: control target
= control target key end

     0   :  { %8 = vsyncpa [#allocation4], 0  ;;  %s3623_s0 = inlined_call_operand.vmem [shape: f32[256,64], index: 0, kind: input, shape index: {}]   ;;  %s3624_s1 = inlined_call_operand.vmem [shape: bf16[1,64,1024], index: 1, kind: input, shape index: {}]   ;;  %s3625_s2 = inlined_call_operand.vmem [shape: f32[1,1024], index: 2, kind: input, shape index: {}]   ;;  %s3626_s3 = inlined_call_operand.hbm [shape: bf16[256,1024], index: 3, kind: output, shape index: {}]  }
   0x1   :  { %10 = vsyncpa [#allocation4 + $0x1], 0  ;;  %s2251_s12 = smov 0   ;;  %s2253_s13 = smov 0  }
   0x2   :  { %s2255_s14 = smov 0   ;;  %s2257_s15 = smov 0  }
   0x3   :  { %s2259_s16 = smov 0   ;;  %s2261_s17 = smov 0  }
   0x4 LB: > { %s1741_s18 = sadd.s32 4294967295, %s2227_s17   ;;  %s1742_s19 = sadd.s32 4294967294, %s2227_s17   ;;  %s2227_s17 = sphi %s2261_s17, %s16_s17   ;;  %s2223_s16 = sphi %s2259_s16, %s3736_s16   ;;  %s2219_s15 = sphi %s2257_s15, %s3735_s15   ;;  %s2215_s14 = sphi %s2255_s14, %s3734_s14   ;;  %s2211_s13 = sphi %s2253_s13, %s3733_s13   ;;  %s2207_s12 = sphi %s2251_s12, %s3732_s12  }
   0x5   : > { %s28_s20 = sadd.s32 1, %s2223_s16  ;;  %s110_s21 = sadd.s32 1, %s2215_s14 }
   0x6   : > { %p30_p0 = scmp.ge.s32.totalorder %s28_s20, 2  ;;  %p120_p1 = scmp.ne.s32.totalorder %s2215_s14, %s2211_s13 }
   0x7   : > { %p121_p2 = scmp.eq.s32.totalorder %s1741_s18, 1  ;;  %p126_p3 = scmp.ne.s32.totalorder %s2211_s13, %s2207_s12 }
   0x8   : > { %s3738_s20 = smov (%p30_p0, %s28_s20), 0  ;;  %p127_p5 = scmp.eq.s32.totalorder %s1742_s19, 1 }
   0x9   : > { %p2291_p4 = por %p121_p2, %p120_p1  ;;  %s105_s23 = ssub.s32 %s2223_s16, %s3738_s20 }
   0xa   : > { %p1746_p6 = scmp.ge.s32.totalorder %s2227_s17, 1  ;;  %p108_p7 = scmp.eq.s32.totalorder %s105_s23, 0 }
   0xb   : > { %p2298_p8 = por %p127_p5, %p126_p3  ;;  %p165_p9 = scmp.lt.s32.totalorder %s2227_s17, 3 }
   0xc   : > { %s2304_s25 = scalar_select %p108_p7, %s2215_s14, %s110_s21  }
   0xd   : > { %p166_p10 = pnand %p1746_p6, %p165_p9 }
   0xe   : > { %s1748_s26 = sshll.u32 (!%p166_p10), %s2219_s15, 4  ;;  %s190_s4 = sand.u32 (!%p166_p10), 1, %s2211_s13  }
   0xf   : > { %169 = sbr.rel (%p166_p10) target bundleno = 625 (0x271), region = 32  ;;  %p194_p11 = scmp.lt.s32.totalorder (!%p166_p10), %s1748_s26, 31 }
  0x10   : > { %s1747_s5 = sshll.u32 (!%p166_p10), %s190_s4, 9  ;;  %s2021_s7 = sshll.u32 (!%p166_p10), %s2219_s15, 9 }
  0x11   : > { %s3324_s6 = scalar_lea.vmem (!%p166_p10), [#allocation3], %s1747_s5  ;;  %s1650_s10 = scalar_lea.hbm (!%p166_p10), %s3626_s3, %s2021_s7 }
  0x12   : > { %s1651_s11 = sshll.u32 (!%p166_p10), %s3324_s6, 4  ;;  %s1653_s18 = sshll.u32 (!%p166_p10), %s1650_s10, 4  ;;  %s1652_s11 = int_to_ptr.vmem [resolvable:$true] %s1651_s11  ;;  %s1654_s18 = int_to_ptr.hbm [resolvable:$true] %s1653_s18 }
  0x13   : > { %s1636_s15 = scalar_lea.sflag (!%p166_p10), [#allocation4], %s190_s4  ;;  %s2163_s19 = sshra.s32 (!%p166_p10), %s1654_s18, 4  ;;  %s2164_s19 = int_to_ptr.hbm [resolvable:$true] %s2163_s19 }
  0x14   : > { %s3740_s26 = smov (!%p194_p11, %s1748_s26), 31  ;;  %vm3627_vm0 = vcmask 523264   ;;  %s2165_s21 = scalar_lea.hbm %s2164_s19, 512 }
  0x15   : > { %s1749_s27 = sshll.u32 %s3740_s26, 3  ;;  %p2166_p12 = scmp.ne.s32.totalorder %s2164_s19, %s2165_s21 }
  0x16   : > { %s2310_s30 = scalar_lea.vmem %s3623_s0, %s1749_s27  ;;  %s2169_s27 = scalar_lea.hbm %s3626_s3, 1024 }
  0x17   : > { %v2313_v0 = vld [vmem:[%s2310_s30 + $0x20] sm:$0xff]  ;;  %v2316_v1 = vld [vmem:[%s2310_s30 + $0x10] sm:$0xff]  ;;  %v2328_v6 = vld [vmem:[%s2310_s30 + $0x28] sm:$0xff]  ;;  %p2167_p13 = pnand %p2166_p12, %p2291_p4  ;;  %p2170_p1 = scmp.lt.s32.totalorder %s2164_s19, %s3626_s3 }
  0x18   : > { %v2319_v2 = vld [vmem:[%s2310_s30] sm:$0xff]  ;;  %v231_v3 = vmul.f32 %v2313_v0, %v2313_v0  ;;  %v229_v4 = vmul.f32 %v2316_v1, %v2316_v1  ;;  %v2331_v7 = vld [vmem:[%s2310_s30 + $0x18] sm:$0xff]  ;;  %v2337_v11 = vld [vmem:[%s2310_s30 + $0x8] sm:$0xff]  ;;  %v232_v12 = vmul.f32 %v2328_v6, %v2328_v6  ;;  %p2171_p2 = scmp.lt.s32.totalorder %s2169_s27, %s2165_s21 }
  0x19   : > { %v227_v5 = vmul.f32 %v2319_v2, %v2319_v2  ;;  %v230_v13 = vmul.f32 %v2331_v7, %v2331_v7  ;;  %v228_v14 = vmul.f32 %v2337_v11, %v2337_v11  ;;  %v2349_v18 = vld [vmem:[%s2310_s30 + $0x38] sm:$0xff]  ;;  %v2352_v19 = vld [vmem:[%s2310_s30 + $0x40] sm:$0xff]  ;;  %v2355_v20 = vld [vmem:[%s2310_s30 + $0x30] sm:$0xff]  ;;  %p2168_p0 = pneg %p2167_p13 }
  0x1a   : > { %v256_v8 = vsel %vm3627_vm0, %v231_v3, 0.0  ;;  %v250_v9 = vsel %vm3627_vm0, %v229_v4, 0.0  ;;  %v259_v15 = vsel %vm3627_vm0, %v232_v12, 0.0  ;;  %v234_v21 = vmul.f32 %v2349_v18, %v2349_v18  ;;  %v222_v27 = vld [vmem:[%s2310_s30 + $0x58] sm:$0xff]  ;;  %v221_v28 = vld [vmem:[%s2310_s30 + $0x50] sm:$0xff]  ;;  %v2369_v29 = vld [vmem:[%s2310_s30 + $0x48] sm:$0xff]  ;;  %p2172_p3 = por %p2171_p2, %p2170_p1 }
  0x1b   : > { %v244_v10 = vsel %vm3627_vm0, %v227_v5, 0.0  ;;  %257 = vadd.xlane.f32.xlu2 %v256_v8  ;;  %251 = vadd.xlane.f32.xlu1 %v250_v9  ;;  %v253_v16 = vsel %vm3627_vm0, %v230_v13, 0.0  ;;  %v247_v17 = vsel %vm3627_vm0, %v228_v14, 0.0  ;;  %v235_v22 = vmul.f32 %v2352_v19, %v2352_v19  ;;  %v224_v36 = vld [vmem:[%s2310_s30 + $0x68] sm:$0xff]  ;;  %v225_v37 = vld [vmem:[%s2310_s30 + $0x70] sm:$0xff]  ;;  %v223_v38 = vld [vmem:[%s2310_s30 + $0x60] sm:$0xff] }
  0x1c   : > { %245 = vadd.xlane.f32.xlu0 %v244_v10  ;;  %v233_v23 = vmul.f32 %v2355_v20, %v2355_v20  ;;  %v265_v24 = vsel %vm3627_vm0, %v234_v21, 0.0  ;;  %v238_v30 = vmul.f32 %v222_v27, %v222_v27  ;;  %v237_v31 = vmul.f32 %v221_v28, %v221_v28  ;;  %v226_v45 = vld [vmem:[%s2310_s30 + $0x78] sm:$0xff]  ;;  %p2173_p5 = pnand %p2172_p3, %p2168_p0 }
  0x1d   : > { %v268_v25 = vsel %vm3627_vm0, %v235_v22, 0.0  ;;  %v236_v32 = vmul.f32 %v2369_v29, %v2369_v29  ;;  %v240_v39 = vmul.f32 %v224_v36, %v224_v36  ;;  %v241_v40 = vmul.f32 %v225_v37, %v225_v37 }
  0x1e   : > { %v262_v26 = vsel %vm3627_vm0, %v233_v23, 0.0  ;;  %v277_v33 = vsel %vm3627_vm0, %v238_v30, 0.0  ;;  %v274_v34 = vsel %vm3627_vm0, %v237_v31, 0.0  ;;  %v239_v41 = vmul.f32 %v223_v38, %v223_v38 }
  0x1f   : > { %v271_v35 = vsel %vm3627_vm0, %v236_v32, 0.0  ;;  %v283_v42 = vsel %vm3627_vm0, %v240_v39, 0.0  ;;  %v286_v43 = vsel %vm3627_vm0, %v241_v40, 0.0  ;;  %v242_v46 = vmul.f32 %v226_v45, %v226_v45 }
  0x20   : > { %v280_v44 = vsel %vm3627_vm0, %v239_v41, 0.0 }
  0x21   : > { %v289_v47 = vsel %vm3627_vm0, %v242_v46, 0.0 }
  0x23   : > { %260 = vadd.xlane.f32.xlu2 %v259_v15  ;;  %254 = vadd.xlane.f32.xlu1 %v253_v16 }
  0x24   : > { %248 = vadd.xlane.f32.xlu0 %v247_v17 }
  0x2b   : > { %266 = vadd.xlane.f32.xlu1 %v265_v24  ;;  %269 = vadd.xlane.f32.xlu2 %v268_v25 }
  0x2c   : > { %263 = vadd.xlane.f32.xlu0 %v262_v26 }
  0x33   : > { %278 = vadd.xlane.f32.xlu2 %v277_v33  ;;  %275 = vadd.xlane.f32.xlu1 %v274_v34 }
  0x34   : > { %272 = vadd.xlane.f32.xlu0 %v271_v35 }
  0x3b   : > { %284 = vadd.xlane.f32.xlu1 %v283_v42  ;;  %287 = vadd.xlane.f32.xlu2 %v286_v43 }
  0x3c   : > { %281 = vadd.xlane.f32.xlu0 %v280_v44 }
  0x44   : > { %290 = vadd.xlane.f32.xlu0 %v289_v47 }
  0x8e   : > { %v258_v48 = vpop.xlane.xlu2 %257  ;;  %v252_v49 = vpop.xlane.xlu1 %251 }
  0x8f   : > { %2079 = vrsqrt.f32 %v258_v48  ;;  %v246_v50 = vpop.xlane.xlu0 %245  ;;  %vm347_vm1 = vcmp.eq.f32.partialorder %v258_v48, inf  ;;  %vm349_vm2 = vcmp.eq.f32.partialorder %v258_v48, 0.0  ;;  %v350_v15 = vand.u32 2147483648, %v258_v48 }
  0x90   : > { %2081 = vrsqrt.f32 %v252_v49  ;;  %vm323_vm3 = vcmp.eq.f32.partialorder %v252_v49, inf  ;;  %vm325_vm4 = vcmp.eq.f32.partialorder %v252_v49, 0.0  ;;  %v326_v26 = vand.u32 2147483648, %v252_v49 }
  0x91   : > { %2083 = vrsqrt.f32 %v246_v50  ;;  %vm299_vm5 = vcmp.eq.f32.partialorder %v246_v50, inf  ;;  %v302_v34 = vand.u32 2147483648, %v246_v50  ;;  %vm301_vm6 = vcmp.eq.f32.partialorder %v246_v50, 0.0 }
  0x95   : > { %v2080_v51 = vpop.eup %2079 }
  0x96   : > { %v2082_v52 = vpop.eup %2081  ;;  %v341_v53 = vmul.f32 %v2080_v51, %v258_v48  ;;  %v2384_v54 = vpop.xlane.xlu2 %260 }
  0x97   : > { %v2386_v55 = vpop.xlane.xlu1 %254  ;;  %v2084_v56 = vpop.eup %2083  ;;  %v317_v57 = vmul.f32 %v2082_v52, %v252_v49  ;;  %2085 = vrsqrt.f32 %v2384_v54  ;;  %vm359_vm7 = vcmp.eq.f32.partialorder %v2384_v54, inf  ;;  %vm361_vm8 = vcmp.eq.f32.partialorder %v2384_v54, 0.0 }
  0x98   : > { %v2389_v58 = vpop.xlane.xlu0 %248  ;;  %v342_v59 = vmul.f32 %v2080_v51, %v341_v53  ;;  %v293_v60 = vmul.f32 %v2084_v56, %v246_v50  ;;  %2087 = vrsqrt.f32 %v2386_v55  ;;  %v362_v45 = vand.u32 2147483648, %v2384_v54 }
  0x99   : > { %v318_v61 = vmul.f32 %v2082_v52, %v317_v57  ;;  %2089 = vrsqrt.f32 %v2389_v58  ;;  %vm335_vm9 = vcmp.eq.f32.partialorder %v2386_v55, inf  ;;  %vm337_vm10 = vcmp.eq.f32.partialorder %v2386_v55, 0.0 }
  0x9a   : > { %v343_v62 = vmul.f32 0.5, %v342_v59  ;;  %v294_v63 = vmul.f32 %v2084_v56, %v293_v60  ;;  %v314_v53 = vand.u32 2147483648, %v2389_v58  ;;  %vm311_vm15 = vcmp.eq.f32.partialorder %v2389_v58, inf }
  0x9b   : > { %v319_v3 = vmul.f32 0.5, %v318_v61 }
  0x9c   : > { %v344_v4 = vsub.f32 1.5, %v343_v62  ;;  %v295_v5 = vmul.f32 0.5, %v294_v63 }
  0x9d   : > { %v2086_v8 = vpop.eup %2085  ;;  %v320_v9 = vsub.f32 1.5, %v319_v3 }
  0x9e   : > { %v2088_v10 = vpop.eup %2087  ;;  %v345_v12 = vmul.f32 %v2080_v51, %v344_v4  ;;  %v296_v13 = vsub.f32 1.5, %v295_v5  ;;  %v353_v14 = vmul.f32 %v2086_v8, %v2384_v54 }
  0x9f   : > { %v321_v16 = vmul.f32 %v2082_v52, %v320_v9  ;;  %v329_v17 = vmul.f32 %v2088_v10, %v2386_v55  ;;  %v2395_v21 = vpop.eup %2089  ;;  %v2413_v43 = vpop.xlane.xlu1 %266  ;;  %v338_v52 = vand.u32 2147483648, %v2386_v55 }
  0xa0   : > { %v346_v22 = vmul.f32 %v345_v12, %v258_v48  ;;  %v297_v23 = vmul.f32 %v2084_v56, %v296_v13  ;;  %v354_v24 = vmul.f32 %v2086_v8, %v353_v14  ;;  %v305_v35 = vmul.f32 %v2395_v21, %v2389_v58  ;;  %v2417_v44 = vpop.xlane.xlu0 %263 }
  0xa1   : > { %v322_v25 = vmul.f32 %v321_v16, %v252_v49  ;;  %v330_v27 = vmul.f32 %v2088_v10, %v329_v17 }
  0xa2   : > { %v348_v28 = vsel %vm347_vm1, %v258_v48, %v346_v22  ;;  %v298_v30 = vmul.f32 %v297_v23, %v246_v50  ;;  %v355_v31 = vmul.f32 0.5, %v354_v24  ;;  %v306_v46 = vmul.f32 %v2395_v21, %v305_v35 }
  0xa3   : > { %v2399_v32 = vsel %vm349_vm2, %v350_v15, %v348_v28  ;;  %v324_v33 = vsel %vm323_vm3, %v252_v49, %v322_v25  ;;  %v331_v42 = vmul.f32 0.5, %v330_v27  ;;  %vm804_vm3 = vcmask 519168  }
  0xa4   : > { %v2404_v36 = vadd.f32 1e-07, %v2399_v32  ;;  %v2406_v37 = vsel %vm325_vm4, %v326_v26, %v324_v33  ;;  %v300_v38 = vsel %vm299_vm5, %v246_v50, %v298_v30  ;;  %v356_v41 = vsub.f32 1.5, %v355_v31  ;;  %v2562_v30 = vpop.xlane.xlu2 %269 }
  0xa5   : > { %v2409_v39 = vadd.f32 1e-07, %v2406_v37  ;;  %v2411_v40 = vsel %vm301_vm6, %v302_v34, %v300_v38  ;;  %v332_v51 = vsub.f32 1.5, %v331_v42  ;;  %v307_v59 = vmul.f32 0.5, %v306_v46 }
  0xa6   : > { %2091 = vrcp.f32 %v2404_v36  ;;  %v585_v47 = vand.u32 2147483647, %v2404_v36  ;;  %v2425_v48 = vadd.f32 1e-07, %v2411_v40  ;;  %v587_v49 = vand.u32 2147483648, %v2404_v36 }
  0xa7   : > { %2093 = vrcp.f32 %v2409_v39  ;;  %v357_v50 = vmul.f32 %v2086_v8, %v356_v41  ;;  %vm581_vm11 = vweird.f32 %v2404_v36  ;;  %v333_v57 = vmul.f32 %v2088_v10, %v332_v51 }
  0xa8   : > { %2095 = vrsqrt.f32 %v2413_v43  ;;  %vm2437_vm12 = vcmp.eq.f32.partialorder %v585_v47, 8.507059e+37  ;;  %vm551_vm13 = vweird.f32 %v2409_v39  ;;  %v555_v62 = vand.u32 2147483647, %v2409_v39 }
  0xa9   : > { %2097 = vrsqrt.f32 %v2417_v44  ;;  %v358_v56 = vmul.f32 %v357_v50, %v2384_v54  ;;  %v557_v63 = vand.u32 2147483648, %v2409_v39  ;;  %v588_v5 = vor.u32 1.1754944e-38, %v587_v49 }
  0xaa   : > { %2099 = vrcp.f32 %v2425_v48  ;;  %v334_v9 = vmul.f32 %v333_v57, %v2386_v55  ;;  %vm488_vm14 = vcmp.gt.f32.partialorder %v2399_v32, 1.0  ;;  %v525_v13 = vand.u32 2147483647, %v2425_v48 }
  0xab   : > { %v360_v8 = vsel %vm359_vm7, %v2384_v54, %v358_v56  ;;  %v308_v15 = vsub.f32 1.5, %v307_v59  ;;  %vm486_vm2 = vcmp.gt.f32.partialorder %v2406_v37, 1.0  ;;  %v527_v25 = vand.u32 2147483648, %v2425_v48 }
  0xac   : > { %v2092_v60 = vpop.eup %2091  ;;  %v2456_v14 = vsel %vm361_vm8, %v362_v45, %v360_v8  ;;  %v336_v23 = vsel %vm335_vm9, %v2386_v55, %v334_v9  ;;  %vm2474_vm4 = vcmp.eq.f32.partialorder %v555_v62, 8.507059e+37  ;;  %vm313_vm5 = vcmp.eq.f32.partialorder %v2389_v58, 0.0 }
  0xad   : > { %v2094_v3 = vpop.eup %2093  ;;  %v577_v4 = vmul.f32 %v2092_v60, %v2404_v36  ;;  %vm582_vm1 = vweird.f32 %v2092_v60  ;;  %v2463_v22 = vadd.f32 1e-07, %v2456_v14  ;;  %v2471_v26 = vsel %vm337_vm10, %v338_v52, %v336_v23 }
  0xae   : > { %v2449_v10 = vpop.eup %2095  ;;  %v547_v12 = vmul.f32 %v2094_v3, %v2409_v39  ;;  %v309_v27 = vmul.f32 %v2395_v21, %v308_v15  ;;  %vm2484_vm6 = vmor %vm581_vm11, %vm582_vm1  ;;  %vm552_vm7 = vweird.f32 %v2094_v3  ;;  %v558_v33 = vor.u32 1.1754944e-38, %v557_v63 }
  0xaf   : > { %v2459_v16 = vpop.eup %2097  ;;  %v578_v17 = vsub.f32 1.0, %v577_v4  ;;  %2101 = vrcp.f32 %v2463_v22  ;;  %vm484_vm8 = vcmp.gt.f32.partialorder %v2411_v40, 1.0  ;;  %v377_v34 = vmul.f32 %v2449_v10, %v2413_v43  ;;  %vm553_vm11 = vmor %vm551_vm13, %vm552_vm7 }
  0xb0   : > { %v2100_v24 = vpop.eup %2099  ;;  %v548_v54 = vsub.f32 1.0, %v547_v12  ;;  %vm521_vm9 = vweird.f32 %v2425_v48  ;;  %v2493_v41 = vadd.f32 1e-07, %v2471_v26  ;;  %vm2495_vm10 = vcmp.eq.f32.partialorder %v525_v13, 8.507059e+37 }
  0xb1   : > { %v579_v28 = vmul.f32 %v2092_v60, %v578_v17  ;;  %v517_v31 = vmul.f32 %v2100_v24, %v2425_v48  ;;  %v528_v45 = vor.u32 1.1754944e-38, %v527_v25  ;;  %v310_v46 = vmul.f32 %v309_v27, %v2389_v58 }
  0xb2   : > { %v549_v21 = vmul.f32 %v2094_v3, %v548_v54  ;;  %vm522_vm1 = vweird.f32 %v2100_v24  ;;  %2103 = vrcp.f32 %v2493_v41  ;;  %vm596_vm0 = vweird.f32 %v2463_v22 }
  0xb3   : > { %v580_v35 = vadd.f32 %v2092_v60, %v579_v28  ;;  %v518_v38 = vsub.f32 1.0, %v517_v31  ;;  %v378_v52 = vmul.f32 %v2449_v10, %v377_v34  ;;  %v600_v32 = vand.u32 2147483647, %v2463_v22 }
  0xb4   : > { %v550_v36 = vadd.f32 %v2094_v3, %v549_v21  ;;  %v365_v28 = vmul.f32 %v2459_v16, %v2417_v44  ;;  %vm566_vm7 = vweird.f32 %v2493_v41 }
  0xb5   : > { %v584_v47 = vsel %vm2484_vm6, %v2092_v60, %v580_v35  ;;  %v519_v49 = vmul.f32 %v2100_v24, %v518_v38  ;;  %v2102_v56 = vpop.eup %2101  ;;  %v312_v60 = vsel %vm311_vm15, %v2389_v58, %v310_v46  ;;  %vm385_vm15 = vcmp.eq.f32.partialorder %v2413_v43, 0.0 }
  0xb6   : > { %v589_v50 = vsel %vm2437_vm12, %v588_v5, %v584_v47  ;;  %v554_v51 = vsel %vm553_vm11, %v2094_v3, %v550_v36  ;;  %vm523_vm12 = vmor %vm521_vm9, %vm522_vm1  ;;  %v592_v63 = vmul.f32 %v2102_v56, %v2463_v22  ;;  %vm597_vm13 = vweird.f32 %v2102_v56 }
  0xb7   : > { %v760_v57 = vsel %vm488_vm14, %v589_v50, 1.0  ;;  %v559_v39 = vsel %vm2474_vm4, %v558_v33, %v554_v51  ;;  %v520_v59 = vadd.f32 %v2100_v24, %v519_v49  ;;  %v602_v5 = vand.u32 2147483648, %v2463_v22  ;;  %v2579_v49 = vpop.xlane.xlu0 %272 }
  0xb8   : > { %v776_v61 = vmul.f32 %v760_v57, %v2313_v0  ;;  %v758_v62 = vsel %vm486_vm2, %v559_v39, 1.0  ;;  %v593_v9 = vsub.f32 1.0, %v592_v63  ;;  %v2531_v37 = vsel %vm313_vm5, %v314_v53, %v312_v60  ;;  %v2104_v48 = vpop.eup %2103  ;;  %vm2547_vm2 = vmor %vm596_vm0, %vm597_vm13 }
  0xb9   : > { %v774_v3 = vmul.f32 %v758_v62, %v2316_v1  ;;  %v524_v4 = vsel %vm523_vm12, %v2100_v24, %v520_v59  ;;  %v2536_v13 = vadd.f32 1e-07, %v2531_v37  ;;  %vm383_vm14 = vcmp.eq.f32.partialorder %v2413_v43, inf }
  0xba   : > { %v792_v8 = vpack.c.bf16 %v776_v61, %v776_v61  ;;  %v529_v0 = vsel %vm2495_vm10, %v528_v45, %v524_v4  ;;  %v594_v17 = vmul.f32 %v2102_v56, %v593_v9  ;;  %v562_v23 = vmul.f32 %v2104_v48, %v2493_v41  ;;  %v2004_v9 = vld [vmem:[%s3624_s1 + $0xc4] sm:$0xf] }
  0xbb   : > { %v790_v12 = vpack.c.bf16 %v774_v3, %v774_v3  ;;  %v756_v1 = vsel %vm484_vm8, %v529_v0, 1.0  ;;  %vm2551_vm4 = vcmp.eq.f32.partialorder %v600_v32, 8.507059e+37  ;;  %v603_v53 = vor.u32 1.1754944e-38, %v602_v5 }
  0xbc   : > { %809 = vst.msk [vmem:[#allocation2 + $0x10] sm:$0xf] %vm804_vm3, %v792_v8  ;;  %v772_v15 = vmul.f32 %v756_v1, %v2319_v2  ;;  %v570_v2 = vand.u32 2147483647, %v2493_v41  ;;  %2105 = vrcp.f32 %v2536_v13  ;;  %v595_v54 = vadd.f32 %v2102_v56, %v594_v17  ;;  %v1888_v1 = vld [vmem:[%s3624_s1 + $0xc8] sm:$0xf] }
  0xbd   : > { %807 = vst.msk [vmem:[#allocation2 + $0x8] sm:$0xf] %vm804_vm3, %v790_v12  ;;  %v563_v25 = vsub.f32 1.0, %v562_v23  ;;  %v379_v27 = vmul.f32 0.5, %v378_v52  ;;  %vm489_vm5 = vcmp.gt.f32.partialorder %v2456_v14, 1.0  ;;  %vm487_vm0 = vcmp.gt.f32.partialorder %v2471_v26, 1.0 }
  0xbe   : > { %v788_v24 = vpack.c.bf16 %v772_v15, %v772_v15  ;;  %v572_v22 = vand.u32 2147483648, %v2493_v41  ;;  %v599_v31 = vsel %vm2547_vm2, %v2102_v56, %v595_v54  ;;  %vm567_vm6 = vweird.f32 %v2104_v48  ;;  %v1880_v26 = vld [vmem:[%s3624_s1 + $0xc0] sm:$0xf]  ;;  %v2005_v54 = vld [vmem:[%s3624_s1 + $0xcc] sm:$0xf] }
  0xbf   : > { %v564_v55 = vmul.f32 %v2104_v48, %v563_v25  ;;  %v380_v21 = vsub.f32 1.5, %v379_v27  ;;  %v604_v14 = vsel %vm2551_vm4, %v603_v53, %v599_v31  ;;  %vm2570_vm8 = vcmp.eq.f32.partialorder %v570_v2, 8.507059e+37  ;;  %vm568_vm9 = vmor %vm566_vm7, %vm567_vm6 }
  0xc0   : > { %805 = vst.msk [vmem:[#allocation2] sm:$0xf] %vm804_vm3, %v788_v24  ;;  %v366_v34 = vmul.f32 %v2459_v16, %v365_v28  ;;  %v761_v35 = vsel %vm489_vm5, %v604_v14, 1.0  ;;  %2107 = vrsqrt.f32 %v2562_v30  ;;  %v573_v46 = vor.u32 1.1754944e-38, %v572_v22 }
  0xc1   : > { %v565_v38 = vadd.f32 %v2104_v48, %v564_v55  ;;  %v381_v36 = vmul.f32 %v2449_v10, %v380_v21  ;;  %v777_v45 = vmul.f32 %v761_v35, %v2328_v6  ;;  %v386_v47 = vand.u32 2147483648, %v2413_v43 }
  0xc2   : > { %v2106_v42 = vpop.eup %2105  ;;  %v367_v41 = vmul.f32 0.5, %v366_v34  ;;  %v540_v52 = vand.u32 2147483647, %v2536_v13  ;;  %v542_v6 = vand.u32 2147483648, %v2536_v13  ;;  %2109 = vrsqrt.f32 %v2579_v49  ;;  %v2659_v34 = vpop.xlane.xlu2 %278 }
  0xc3   : > { %v569_v50 = vsel %vm568_vm9, %v2104_v48, %v565_v38  ;;  %v532_v51 = vmul.f32 %v2106_v42, %v2536_v13  ;;  %v382_v56 = vmul.f32 %v381_v36, %v2413_v43  ;;  %v793_v10 = vpack.c.bf16 %v777_v45, %v777_v45  ;;  %v1882_v48 = vld [vmem:[%s3624_s1 + $0xe0] sm:$0xf0] }
  0xc4   : > { %v574_v57 = vsel %vm2570_vm8, %v573_v46, %v569_v50  ;;  %v368_v39 = vsub.f32 1.5, %v367_v41  ;;  %vm371_vm10 = vcmp.eq.f32.partialorder %v2417_v44, inf  ;;  %vm537_vm11 = vweird.f32 %v2106_v42  ;;  %v1848_v46 = vld [vmem:[%s3624_s1 + $0x80] sm:$0xf] }
  0xc5   : > { %v759_v59 = vsel %vm487_vm0, %v574_v57, 1.0  ;;  %v533_v60 = vsub.f32 1.0, %v532_v51  ;;  %v384_v61 = vsel %vm383_vm14, %v2413_v43, %v382_v56  ;;  %810 = vst.msk [vmem:[#allocation2 + $0x14] sm:$0xf] %vm804_vm3, %v793_v10  ;;  %v2008_v43 = vld [vmem:[%s3624_s1 + $0xdc] sm:$0xf0]  ;;  %vm536_vm13 = vweird.f32 %v2536_v13  ;;  %v2675_v51 = vpop.xlane.xlu1 %275 }
  0xc6   : > { %v775_v62 = vmul.f32 %v759_v59, %v2331_v7  ;;  %v2597_v63 = vsel %vm385_vm15, %v386_v47, %v384_v61  ;;  %v369_v32 = vmul.f32 %v2459_v16, %v368_v39  ;;  %v2108_v3 = vpop.eup %2107  ;;  %v374_v7 = vand.u32 2147483648, %v2417_v44  ;;  %vm538_vm14 = vmor %vm536_vm13, %vm537_vm11  ;;  %v2009_v13 = vld [vmem:[%s3624_s1 + $0xe4] sm:$0xf0]  ;;  %v1996_v56 = vld [vmem:[%s3624_s1 + $0x84] sm:$0xf] }
  0xc7   : > { %v534_v4 = vmul.f32 %v2106_v42, %v533_v60  ;;  %v2605_v5 = vadd.f32 1e-07, %v2597_v63  ;;  %vm373_vm1 = vcmp.eq.f32.partialorder %v2417_v44, 0.0  ;;  %v389_v0 = vmul.f32 %v2108_v3, %v2562_v30  ;;  %v1856_v61 = vld [vmem:[%s3624_s1 + $0x88] sm:$0xf] }
  0xc8   : > { %v791_v8 = vpack.c.bf16 %v775_v62, %v775_v62  ;;  %v370_v16 = vmul.f32 %v369_v32, %v2417_v44  ;;  %vm485_vm12 = vcmp.gt.f32.partialorder %v2531_v37, 1.0  ;;  %v543_v15 = vor.u32 1.1754944e-38, %v542_v6  ;;  %v2634_v40 = vpop.eup %2109  ;;  %v1850_v6 = vld [vmem:[%s3624_s1 + $0xa0] sm:$0xf0]  ;;  %v2001_v62 = vld [vmem:[%s3624_s1 + $0xa4] sm:$0xf0] }
  0xc9   : > { %v535_v12 = vadd.f32 %v2106_v42, %v534_v4  ;;  %2111 = vrcp.f32 %v2605_v5  ;;  %v390_v23 = vmul.f32 %v2108_v3, %v389_v0  ;;  %v1881_v58 = vor.u32 %v2008_v43, %v1880_v26 }
  0xca   : > { %808 = vst.msk [vmem:[#allocation2 + $0xc] sm:$0xf] %vm804_vm3, %v791_v8  ;;  %v372_v17 = vsel %vm371_vm10, %v2417_v44, %v370_v16  ;;  %vm541_vm15 = vcmp.eq.f32.partialorder %v540_v52, 8.507059e+37  ;;  %v1885_v24 = vor.u32 %v2004_v9, %v1882_v48  ;;  %vm395_vm2 = vcmp.eq.f32.partialorder %v2562_v30, inf  ;;  %v1890_v44 = vld [vmem:[%s3624_s1 + $0xe8] sm:$0xf0] }
  0xcb   : > { %v539_v53 = vsel %vm538_vm14, %v2106_v42, %v535_v12  ;;  %v2638_v2 = vsel %vm373_vm1, %v374_v7, %v372_v17  ;;  %vm397_vm4 = vcmp.eq.f32.partialorder %v2562_v30, 0.0  ;;  %1119 = vmatpush.bf16.msra.mxu0 %v1881_v58  ;;  %v391_v28 = vmul.f32 0.5, %v390_v23  ;;  %v2000_v52 = vld [vmem:[%s3624_s1 + $0x9c] sm:$0xf0]  ;;  %v1997_v9 = vld [vmem:[%s3624_s1 + $0x8c] sm:$0xf] }
  0xcc   : > { %v544_v25 = vsel %vm541_vm15, %v543_v15, %v539_v53  ;;  %v2644_v27 = vadd.f32 1e-07, %v2638_v2  ;;  %v401_v31 = vmul.f32 %v2634_v40, %v2579_v49  ;;  %1168 = vmatpush.bf16.msra.mxu1 %v1885_v24  ;;  %v1889_v55 = vor.u32 %v2009_v13, %v1888_v1 }
  0xcd   : > { %v757_v22 = vsel %vm485_vm12, %v544_v25, 1.0  ;;  %v630_v14 = vand.u32 2147483647, %v2605_v5  ;;  %v398_v33 = vand.u32 2147483648, %v2562_v30  ;;  %v632_v37 = vand.u32 2147483648, %v2605_v5 }
  0xce   : > { %v773_v21 = vmul.f32 %v757_v22, %v2337_v11  ;;  %2113 = vrcp.f32 %v2644_v27  ;;  %v392_v38 = vsub.f32 1.5, %v391_v28  ;;  %v402_v36 = vmul.f32 %v2634_v40, %v401_v31  ;;  %1217 = vmatpush.bf16.msra.mxu2 %v1889_v55  ;;  %v2753_v22 = vpop.xlane.xlu1 %284 }
  0xcf   : > { %v2661_v35 = vpop.eup %2111  ;;  %vm407_vm5 = vcmp.eq.f32.partialorder %v2579_v49, inf  ;;  %v1893_v42 = vor.u32 %v2005_v54, %v1890_v44  ;;  %vm491_vm0 = vcmp.gt.f32.partialorder %v2597_v63, 1.0  ;;  %vm409_vm6 = vcmp.eq.f32.partialorder %v2579_v49, 0.0 }
  0xd0   : > { %v789_v11 = vpack.c.bf16 %v773_v21, %v773_v21  ;;  %v622_v45 = vmul.f32 %v2661_v35, %v2605_v5  ;;  %v393_v47 = vmul.f32 %v2108_v3, %v392_v38  ;;  %v403_v41 = vmul.f32 0.5, %v402_v36 }
  0xd1   : > { %v410_v50 = vand.u32 2147483648, %v2579_v49  ;;  %1266 = vmatpush.bf16.msra.mxu3 %v1893_v42  ;;  %2115 = vrsqrt.f32 %v2659_v34  ;;  %vm626_vm7 = vweird.f32 %v2605_v5  ;;  %vm627_vm8 = vweird.f32 %v2661_v35  ;;  %v1858_v5 = vld [vmem:[%s3624_s1 + $0xa8] sm:$0xf0] }
  0xd2   : > { %806 = vst.msk [vmem:[#allocation2 + $0x4] sm:$0xf] %vm804_vm3, %v789_v11  ;;  %v623_v10 = vsub.f32 1.0, %v622_v45  ;;  %vm2686_vm9 = vcmp.eq.f32.partialorder %v630_v14, 8.507059e+37  ;;  %v633_v39 = vor.u32 1.1754944e-38, %v632_v37  ;;  %vm611_vm10 = vweird.f32 %v2644_v27  ;;  %vm2711_vm1 = vmor %vm626_vm7, %vm627_vm8 }
  0xd3   : > { %v394_v59 = vmul.f32 %v393_v47, %v2562_v30  ;;  %v404_v60 = vsub.f32 1.5, %v403_v41  ;;  %vm490_vm11 = vcmp.gt.f32.partialorder %v2638_v2, 1.0  ;;  %v615_v3 = vand.u32 2147483647, %v2644_v27  ;;  %v1988_v41 = vld [vmem:[%s3624_s1 + $0x44] sm:$0xf] }
  0xd4   : > { %v2701_v32 = vpop.eup %2113  ;;  %v624_v26 = vmul.f32 %v2661_v35, %v623_v10  ;;  %2117 = vrsqrt.f32 %v2675_v51  ;;  %v1849_v4 = vor.u32 %v2000_v52, %v1848_v46  ;;  %v617_v8 = vand.u32 2147483648, %v2644_v27  ;;  %v1824_v52 = vld [vmem:[%s3624_s1 + $0x48] sm:$0xf]  ;;  %v1980_v2 = vld [vmem:[%s3624_s1 + $0x4] sm:$0xf] }
  0xd5   : > { %v607_v43 = vmul.f32 %v2701_v32, %v2644_v27  ;;  %v396_v16 = vsel %vm395_vm2, %v2562_v30, %v394_v59  ;;  %v405_v0 = vmul.f32 %v2634_v40, %v404_v60  ;;  %v1853_v1 = vor.u32 %v1996_v56, %v1850_v6  ;;  %v1993_v56 = vld [vmem:[%s3624_s1 + $0x64] sm:$0xf0]  ;;  %v1989_v6 = vld [vmem:[%s3624_s1 + $0x4c] sm:$0xf]  ;;  %v1784_v59 = vld [vmem:[%s3624_s1] sm:$0xf] }
  0xd6   : > { %v625_v48 = vadd.f32 %v2661_v35, %v624_v26  ;;  %v2731_v12 = vsel %vm397_vm4, %v398_v33, %v396_v16  ;;  %1120 = vmatpush.bf16.msra.mxu0 %v1849_v4  ;;  %v1857_v15 = vor.u32 %v2001_v62, %v1856_v61  ;;  %vm612_vm12 = vweird.f32 %v2701_v32  ;;  %v1984_v60 = vld [vmem:[%s3624_s1 + $0x1c] sm:$0xf0] }
  0xd7   : > { %v2733_v17 = vpop.eup %2115  ;;  %v608_v23 = vsub.f32 1.0, %v607_v43  ;;  %v2737_v58 = vadd.f32 1e-07, %v2731_v12  ;;  %v406_v13 = vmul.f32 %v405_v0, %v2579_v49  ;;  %vm2743_vm13 = vcmp.eq.f32.partialorder %v615_v3, 8.507059e+37  ;;  %1169 = vmatpush.bf16.msra.mxu1 %v1853_v1  ;;  %vm2763_vm14 = vmor %vm611_vm10, %vm612_vm12 }
  0xd8   : > { %v629_v40 = vsel %vm2711_vm1, %v2661_v35, %v625_v48  ;;  %v425_v53 = vmul.f32 %v2733_v17, %v2659_v34  ;;  %1218 = vmatpush.bf16.msra.mxu2 %v1857_v15  ;;  %v1861_v24 = vor.u32 %v1997_v9, %v1858_v5  ;;  %v618_v44 = vor.u32 1.1754944e-38, %v617_v8  ;;  %v1786_v8 = vld [vmem:[%s3624_s1 + $0x20] sm:$0xf0]  ;;  %v1792_v9 = vld [vmem:[%s3624_s1 + $0x8] sm:$0xf] }
  0xd9   : > { %v634_v54 = vsel %vm2686_vm9, %v633_v39, %v629_v40  ;;  %v609_v25 = vmul.f32 %v2701_v32, %v608_v23  ;;  %2119 = vrcp.f32 %v2737_v58  ;;  %v645_v21 = vand.u32 2147483647, %v2737_v58  ;;  %v1826_v39 = vld [vmem:[%s3624_s1 + $0x68] sm:$0xf0]  ;;  %v1985_v5 = vld [vmem:[%s3624_s1 + $0x24] sm:$0xf0] }
  0xda   : > { %v2755_v28 = vpop.eup %2117  ;;  %v763_v31 = vsel %vm491_vm0, %v634_v54, 1.0  ;;  %v647_v14 = vand.u32 2147483648, %v2737_v58  ;;  %v408_v33 = vsel %vm407_vm5, %v2579_v49, %v406_v13  ;;  %vm431_vm15 = vcmp.eq.f32.partialorder %v2659_v34, inf  ;;  %1267 = vmatpush.bf16.msra.mxu3 %v1861_v24  ;;  %v1992_v49 = vld [vmem:[%s3624_s1 + $0x5c] sm:$0xf0] }
  0xdb   : > { %v779_v63 = vmul.f32 %v763_v31, %v2349_v18  ;;  %v610_v35 = vadd.f32 %v2701_v32, %v609_v25  ;;  %v2779_v27 = vsel %vm409_vm6, %v410_v50, %v408_v33  ;;  %v426_v37 = vmul.f32 %v2733_v17, %v425_v53  ;;  %v1816_v18 = vld [vmem:[%s3624_s1 + $0x40] sm:$0xf]  ;;  %v1818_v50 = vld [vmem:[%s3624_s1 + $0x60] sm:$0xf0]  ;;  %v1981_v24 = vld [vmem:[%s3624_s1 + $0xc] sm:$0xf] }
  0xdc   : > { %vm433_vm2 = vcmp.eq.f32.partialorder %v2659_v34, 0.0  ;;  %v2784_v38 = vadd.f32 1e-07, %v2779_v27  ;;  %v434_v36 = vand.u32 2147483648, %v2659_v34  ;;  %v422_v42 = vand.u32 2147483648, %v2675_v51 }
  0xdd   : > { %2121 = vrsqrt.f32 %v2753_v22  ;;  %v795_v11 = vpack.c.bf16 %v779_v63, %v779_v63  ;;  %v614_v45 = vsel %vm2763_vm14, %v2701_v32, %v610_v35  ;;  %v427_v46 = vmul.f32 0.5, %v426_v37  ;;  %v1794_v54 = vld [vmem:[%s3624_s1 + $0x28] sm:$0xf0] }
  0xde   : > { %v413_v47 = vmul.f32 %v2755_v28, %v2675_v51  ;;  %v619_v10 = vsel %vm2743_vm13, %v618_v44, %v614_v45  ;;  %vm641_vm4 = vweird.f32 %v2737_v58  ;;  %vm2815_vm5 = vcmp.eq.f32.partialorder %v645_v21, 8.507059e+37  ;;  %v1904_v21 = vld [vmem:[%s3624_s1 + $0xd8] sm:$0xf] }
  0xdf   : > { %2123 = vrcp.f32 %v2784_v38  ;;  %v2832_v61 = vpop.eup %2119  ;;  %812 = vst.msk [vmem:[#allocation2 + $0x1c] sm:$0xf] %vm804_vm3, %v795_v11  ;;  %v762_v62 = vsel %vm490_vm11, %v619_v10, 1.0  ;;  %vm492_vm0 = vcmp.gt.f32.partialorder %v2731_v12, 1.0  ;;  %v648_v32 = vor.u32 1.1754944e-38, %v647_v14 }
  0xe0   : > { %v428_v26 = vsub.f32 1.5, %v427_v46  ;;  %v414_v3 = vmul.f32 %v2755_v28, %v413_v47  ;;  %vm419_vm6 = vcmp.eq.f32.partialorder %v2675_v51, inf  ;;  %v778_v4 = vmul.f32 %v762_v62, %v2355_v20  ;;  %v2011_v14 = vld [vmem:[%s3624_s1 + $0xf4] sm:$0xf0]  ;;  %v2903_v47 = vld [vmem:[#allocation2] sm:$0xff] }
  0xe1   : > { %v637_v7 = vmul.f32 %v2832_v61, %v2737_v58  ;;  %vm656_vm7 = vweird.f32 %v2784_v38  ;;  %v660_v43 = vand.u32 2147483647, %v2784_v38  ;;  %vm642_vm8 = vweird.f32 %v2832_v61  ;;  %v1906_v58 = vld [vmem:[%s3624_s1 + $0xf8] sm:$0xf0] }
  0xe2   : > { %v429_v16 = vmul.f32 %v2733_v17, %v428_v26  ;;  %v415_v20 = vmul.f32 0.5, %v414_v3  ;;  %v1817_v0 = vor.u32 %v1992_v49, %v1816_v18  ;;  %v794_v1 = vpack.c.bf16 %v778_v4, %v778_v4  ;;  %vm2880_vm9 = vmor %vm641_vm4, %vm642_vm8  ;;  %v2007_v49 = vld [vmem:[%s3624_s1 + $0xdc] sm:$0xf] }
  0xe3   : > { %v2859_v48 = vpop.eup %2121  ;;  %v638_v15 = vsub.f32 1.0, %v637_v7  ;;  %v1821_v23 = vor.u32 %v1988_v41, %v1818_v50  ;;  %v1825_v13 = vor.u32 %v1993_v56, %v1824_v52  ;;  %v1829_v17 = vor.u32 %v1989_v6, %v1826_v39  ;;  %v2959_v7 = vpop.xlane.xlu2 %287 }
  0xe4   : > { %v430_v40 = vmul.f32 %v429_v16, %v2659_v34  ;;  %v416_v30 = vsub.f32 1.5, %v415_v20  ;;  %1121 = vmatpush.bf16.msra.mxu0 %v1817_v0  ;;  %v1785_v53 = vor.u32 %v1984_v60, %v1784_v59  ;;  %811 = vst.msk [vmem:[#allocation2 + $0x18] sm:$0xf] %vm804_vm3, %v794_v1  ;;  %v1789_v31 = vor.u32 %v1980_v2, %v1786_v8  ;;  %v2010_v60 = vld [vmem:[%s3624_s1 + $0xec] sm:$0xf0] }
  0xe5   : > { %v2124_v25 = vpop.eup %2123  ;;  %v639_v44 = vmul.f32 %v2832_v61, %v638_v15  ;;  %1170 = vmatpush.bf16.msra.mxu1 %v1821_v23  ;;  %1219 = vmatpush.bf16.msra.mxu2 %v1825_v13  ;;  %v1793_v55 = vor.u32 %v1985_v5, %v1792_v9  ;;  %v662_v35 = vand.u32 2147483648, %v2784_v38  ;;  %v1797_v46 = vor.u32 %v1981_v24, %v1794_v54 }
  0xe6   : > { %v652_v63 = vmul.f32 %v2124_v25, %v2784_v38  ;;  %v432_v37 = vsel %vm431_vm15, %v2659_v34, %v430_v40  ;;  %v417_v18 = vmul.f32 %v2755_v28, %v416_v30  ;;  %1268 = vmatpush.bf16.msra.mxu3 %v1829_v17  ;;  %v1905_v28 = vor.u32 %v2011_v14, %v1904_v21 }
  0xe7   : > { %v640_v11 = vadd.f32 %v2832_v61, %v639_v44  ;;  %v2901_v45 = vsel %vm433_vm2, %v434_v36, %v432_v37  ;;  %vm657_vm10 = vweird.f32 %v2124_v25  ;;  %vm421_vm11 = vcmp.eq.f32.partialorder %v2675_v51, 0.0  ;;  %v2913_v36 = vpop.xlane.xlu0 %281 }
  0xe8   : > { %v653_v41 = vsub.f32 1.0, %v652_v63  ;;  %v2906_v50 = vadd.f32 1e-07, %v2901_v45  ;;  %v418_v52 = vmul.f32 %v417_v18, %v2675_v51  ;;  %1122 = vmatpush.bf16.msra.mxu0 %v1785_v53  ;;  %v1909_v34 = vor.u32 %v2007_v49, %v1906_v58  ;;  %vm2925_vm1 = vmor %vm656_vm7, %vm657_vm10  ;;  %v2999_v63 = vld [vmem:[#allocation2 + $0x8] sm:$0xff] }
  0xe9   : > { %v644_v56 = vsel %vm2880_vm9, %v2832_v61, %v640_v11  ;;  %1171 = vmatpush.bf16.msra.mxu1 %v1789_v31  ;;  %1220 = vmatpush.bf16.msra.mxu2 %v1793_v55  ;;  %v449_v39 = vmul.f32 %v2859_v48, %v2753_v22  ;;  %v663_v57 = vor.u32 1.1754944e-38, %v662_v35  ;;  %vm3658_vm12 = vcmask 523264  }
  0xea   : > { %v649_v10 = vsel %vm2815_vm5, %v648_v32, %v644_v56  ;;  %v654_v6 = vmul.f32 %v2124_v25, %v653_v41  ;;  %2125 = vrcp.f32 %v2906_v50  ;;  %1269 = vmatpush.bf16.msra.mxu3 %v1797_v46  ;;  %v420_v61 = vsel %vm419_vm6, %v2675_v51, %v418_v52  ;;  %vm3659_vm14 = vmmov %vm3658_vm12 }
  0xeb   : > { %v764_v59 = vsel %vm492_vm0, %v649_v10, 1.0  ;;  %1910 = vmatmul.msk.bf16.vlgmr.msra.gmra.mxu0 %vm3658_vm12, %v2903_v47  ;;  %vm661_vm13 = vcmp.eq.f32.partialorder %v660_v43, 8.507059e+37  ;;  %v2941_v32 = vsel %vm421_vm11, %v422_v42, %v420_v61  ;;  %vm3660_vm15 = vmmov %vm3658_vm12  ;;  %vm493_vm2 = vcmp.gt.f32.partialorder %v2779_v27, 1.0  ;;  %v1896_v10 = vld [vmem:[%s3624_s1 + $0xd0] sm:$0xf] }
  0xec   : > { %v780_v62 = vmul.f32 %v764_v59, %v2352_v19  ;;  %v655_v12 = vadd.f32 %v2124_v25, %v654_v6  ;;  %1918 = vmatmul.msk.bf16.vlgmr.msra.gmra.mxu1 %vm3659_vm14, %v2903_v47  ;;  %1926 = vmatmul.msk.bf16.vlgmr.msra.gmra.mxu2 %vm3660_vm15, %v2903_v47  ;;  %v2949_v19 = vadd.f32 1e-07, %v2941_v32  ;;  %vm3661_vm4 = vmmov %vm3658_vm12  ;;  %v450_v42 = vmul.f32 %v2859_v48, %v449_v39  ;;  %v1898_v61 = vld [vmem:[%s3624_s1 + $0xf0] sm:$0xf0] }
  0xed   : > { %1413 = vmatpush.bf16.msrb.mxu2 %v1905_v28  ;;  %1934 = vmatmul.msk.bf16.vlgmr.msra.gmra.mxu3 %vm3661_vm4, %v2903_v47  ;;  %vm686_vm5 = vweird.f32 %v2906_v50  ;;  %v690_v16 = vand.u32 2147483647, %v2906_v50  ;;  %v692_v20 = vand.u32 2147483648, %v2906_v50  ;;  %vm495_vm6 = vcmp.gt.f32.partialorder %v2901_v45, 1.0  ;;  %vm3669_vm15 = vmmov %vm3661_vm4 }
  0xee   : > { %1462 = vmatpush.bf16.msrb.mxu3 %v1909_v34  ;;  %v796_v38 = vpack.c.bf16 %v780_v62, %v780_v62  ;;  %v659_v51 = vsel %vm2925_vm1, %v2124_v25, %v655_v12  ;;  %2127 = vrcp.f32 %v2949_v19  ;;  %v451_v27 = vmul.f32 0.5, %v450_v42 }
  0xef   : > { %v664_v26 = vsel %vm661_vm13, %v663_v57, %v659_v51  ;;  %2129 = vrsqrt.f32 %v2913_v36  ;;  %v2963_v8 = vpop.xlane.xlu0 %290  ;;  %vm455_vm7 = vcmp.eq.f32.partialorder %v2753_v22, inf  ;;  %vm457_vm8 = vcmp.eq.f32.partialorder %v2753_v22, 0.0  ;;  %vm3666_vm13 = vmmov %vm3661_vm4  ;;  %v2006_v57 = vld [vmem:[%s3624_s1 + $0xd4] sm:$0xf] }
  0xf0   : > { %v2126_v3 = vpop.eup %2125  ;;  %813 = vst.msk [vmem:[#allocation2 + $0x20] sm:$0xf] %vm804_vm3, %v796_v38  ;;  %v765_v4 = vsel %vm493_vm2, %v664_v26, 1.0  ;;  %v452_v0 = vsub.f32 1.5, %v451_v27  ;;  %2131 = vrsqrt.f32 %v2959_v7  ;;  %v458_v23 = vand.u32 2147483648, %v2753_v22  ;;  %vm3670_vm2 = vmmov %vm3661_vm4 }
  0xf1   : > { %v781_v43 = vmul.f32 %v765_v4, %v2369_v29  ;;  %v682_v2 = vmul.f32 %v2126_v3, %v2906_v50  ;;  %vm687_vm0 = vweird.f32 %v2126_v3  ;;  %2133 = vrsqrt.f32 %v2963_v8  ;;  %v2143_v50 = vld [vmem:[%s2310_s30 + $0x58] sm:$0xff]  ;;  %v2144_v4 = vld [vmem:[%s2310_s30 + $0x50] sm:$0xff] }
  0xf2   : > { %v453_v29 = vmul.f32 %v2859_v48, %v452_v0  ;;  %vm2978_vm9 = vmor %vm686_vm5, %vm687_vm0  ;;  %v693_v48 = vor.u32 1.1754944e-38, %v692_v20  ;;  %v677_v17 = vand.u32 2147483648, %v2949_v19  ;;  %vm691_vm10 = vcmp.eq.f32.partialorder %v690_v16, 8.507059e+37 }
  0xf3   : > { %v797_v9 = vpack.c.bf16 %v781_v43, %v781_v43  ;;  %v683_v5 = vsub.f32 1.0, %v682_v2  ;;  %vm671_vm11 = vweird.f32 %v2949_v19  ;;  %v675_v44 = vand.u32 2147483647, %v2949_v19  ;;  %vm3671_vm0 = vmmov %vm3670_vm2 }
  0xf4   : > { %v2128_v1 = vpop.eup %2127  ;;  %v454_v53 = vmul.f32 %v453_v29, %v2753_v22  ;;  %v678_v49 = vor.u32 1.1754944e-38, %v677_v17  ;;  %vm494_vm4 = vcmp.gt.f32.partialorder %v2941_v32, 1.0  ;;  %vm443_vm5 = vcmp.eq.f32.partialorder %v2913_v36, inf }
  0xf5   : > { %814 = vst.msk [vmem:[#allocation2 + $0x24] sm:$0xf] %vm804_vm3, %v797_v9  ;;  %v684_v15 = vmul.f32 %v2126_v3, %v683_v5  ;;  %v2130_v13 = vpop.eup %2129  ;;  %v667_v30 = vmul.f32 %v2128_v1, %v2949_v19  ;;  %vm672_vm1 = vweird.f32 %v2128_v1  ;;  %vm3021_vm14 = vcmp.eq.f32.partialorder %v675_v44, 8.507059e+37  ;;  %v1874_v44 = vld [vmem:[%s3624_s1 + $0xb8] sm:$0xf0] }
  0xf6   : > { %v437_v54 = vmul.f32 %v2130_v13, %v2913_v36  ;;  %v456_v31 = vsel %vm455_vm7, %v2753_v22, %v454_v53  ;;  %v2991_v55 = vpop.eup %2131  ;;  %vm3010_vm12 = vmor %vm671_vm11, %vm672_vm1  ;;  %v446_v38 = vand.u32 2147483648, %v2913_v36  ;;  %v1897_v42 = vor.u32 %v2010_v60, %v1896_v10  ;;  %v2003_v53 = vld [vmem:[%s3624_s1 + $0xb4] sm:$0xf0]  ;;  %v2145_v10 = vld [vmem:[%s2310_s30 + $0x68] sm:$0xff] }
  0xf7   : > { %v685_v24 = vadd.f32 %v2126_v3, %v684_v15  ;;  %v668_v25 = vsub.f32 1.0, %v667_v30  ;;  %v2997_v14 = vsel %vm457_vm8, %v458_v23, %v456_v31  ;;  %v3001_v35 = vpop.eup %2133  ;;  %v461_v28 = vmul.f32 %v2991_v55, %v2959_v7  ;;  %v1995_v60 = vld [vmem:[%s3624_s1 + $0x74] sm:$0xf0] }
  0xf8   : > { %v438_v33 = vmul.f32 %v2130_v13, %v437_v54  ;;  %v3004_v58 = vadd.f32 1e-07, %v2997_v14  ;;  %v473_v41 = vmul.f32 %v3001_v35, %v2963_v8  ;;  %v1901_v26 = vor.u32 %v2006_v57, %v1898_v61  ;;  %1315 = vmatpush.bf16.msrb.mxu0 %v1897_v42  ;;  %v1832_v42 = vld [vmem:[%s3624_s1 + $0x50] sm:$0xf] }
  0xf9   : > { %v689_v21 = vsel %vm2978_vm9, %v2126_v3, %v685_v24  ;;  %v669_v18 = vmul.f32 %v2128_v1, %v668_v25  ;;  %v462_v6 = vmul.f32 %v2991_v55, %v461_v28  ;;  %vm467_vm7 = vcmp.eq.f32.partialorder %v2959_v7, inf  ;;  %v1999_v24 = vld [vmem:[%s3624_s1 + $0x9c] sm:$0xf] }
  0xfa   : > { %v694_v37 = vsel %vm691_vm10, %v693_v48, %v689_v21  ;;  %v439_v46 = vmul.f32 0.5, %v438_v33  ;;  %2135 = vrcp.f32 %v3004_v58  ;;  %v474_v62 = vmul.f32 %v3001_v35, %v473_v41  ;;  %1364 = vmatpush.bf16.msrb.mxu1 %v1901_v26 }
  0xfb   : > { %v767_v11 = vsel %vm495_vm6, %v694_v37, 1.0  ;;  %1911 = vmatmul.msk.bf16.gmra.mxu0 %vm3666_vm13, %v2999_v63  ;;  %v670_v45 = vadd.f32 %v2128_v1, %v669_v18  ;;  %vm445_vm6 = vcmp.eq.f32.partialorder %v2913_v36, 0.0  ;;  %v463_v3 = vmul.f32 0.5, %v462_v6  ;;  %v1864_v37 = vld [vmem:[%s3624_s1 + $0x90] sm:$0xf] }
  0xfc   : > { %v783_v52 = vmul.f32 %v2143_v50, %v767_v11  ;;  %1919 = vmatmul.msk.bf16.gmra.mxu1 %vm3669_vm15, %v2999_v63  ;;  %1927 = vmatmul.msk.bf16.gmra.mxu2 %vm3670_vm2, %v2999_v63  ;;  %v440_v34 = vsub.f32 1.5, %v439_v46  ;;  %v475_v2 = vmul.f32 0.5, %v474_v62  ;;  %vm469_vm8 = vcmp.eq.f32.partialorder %v2959_v7, 0.0  ;;  %v2002_v18 = vld [vmem:[%s3624_s1 + $0xac] sm:$0xf0]  ;;  %vm3674_vm15 = vmmov %vm3671_vm0 }
  0xfd   : > { %1935 = vmatmul.msk.bf16.gmra.mxu3 %vm3671_vm0, %v2999_v63  ;;  %v674_v59 = vsel %vm3010_vm12, %v2128_v1, %v670_v45  ;;  %v464_v20 = vsub.f32 1.5, %v463_v3  ;;  %v470_v0 = vand.u32 2147483648, %v2959_v7  ;;  %vm479_vm9 = vcmp.eq.f32.partialorder %v2963_v8, inf  ;;  %v3114_v11 = vld [vmem:[#allocation2 + $0x10] sm:$0xff]  ;;  %vm3675_vm2 = vmmov %vm3671_vm0  ;;  %v1991_v62 = vld [vmem:[%s3624_s1 + $0x5c] sm:$0xf] }
  0xfe   : > { %v799_v39 = vpack.c.bf16 %v783_v52, %v783_v52  ;;  %v679_v12 = vsel %vm3021_vm14, %v678_v49, %v674_v59  ;;  %v441_v19 = vmul.f32 %v2130_v13, %v440_v34  ;;  %v720_v5 = vand.u32 2147483647, %v3004_v58  ;;  %v1866_v34 = vld [vmem:[%s3624_s1 + $0xb0] sm:$0xf0]  ;;  %v1840_v59 = vld [vmem:[%s3624_s1 + $0x58] sm:$0xf] }
  0xff   : > { %v766_v51 = vsel %vm494_vm4, %v679_v12, 1.0  ;;  %v722_v1 = vand.u32 2147483648, %v3004_v58  ;;  %v465_v23 = vmul.f32 %v2991_v55, %v464_v20  ;;  %v476_v13 = vsub.f32 1.5, %v475_v2  ;;  %vm3676_vm4 = vmmov %vm3671_vm0 }
 0x100   : > { %816 = vst.msk [vmem:[#allocation2 + $0x2c] sm:$0xf] %vm804_vm3, %v799_v39  ;;  %v782_v27 = vmul.f32 %v2144_v4, %v766_v51  ;;  %v442_v43 = vmul.f32 %v441_v19, %v2913_v36  ;;  %v2136_v16 = vpop.eup %2135  ;;  %vm716_vm10 = vweird.f32 %v3004_v58  ;;  %vm481_vm1 = vcmp.eq.f32.partialorder %v2963_v8, 0.0  ;;  %v1842_v51 = vld [vmem:[%s3624_s1 + $0x78] sm:$0xf0] }
 0x101   : > { %v712_v9 = vmul.f32 %v2136_v16, %v3004_v58  ;;  %vm717_vm11 = vweird.f32 %v2136_v16  ;;  %v466_v30 = vmul.f32 %v465_v23, %v2959_v7  ;;  %v477_v17 = vmul.f32 %v3001_v35, %v476_v13  ;;  %v1994_v4 = vld [vmem:[%s3624_s1 + $0x6c] sm:$0xf0] }
 0x102   : > { %v798_v32 = vpack.c.bf16 %v782_v27, %v782_v27  ;;  %v444_v29 = vsel %vm443_vm5, %v2913_v36, %v442_v43  ;;  %v1872_v36 = vld [vmem:[%s3624_s1 + $0x98] sm:$0xf]  ;;  %v482_v25 = vand.u32 2147483648, %v2963_v8  ;;  %vm3096_vm12 = vmor %vm716_vm10, %vm717_vm11  ;;  %v723_v55 = vor.u32 1.1754944e-38, %v722_v1  ;;  %v1990_v27 = vld [vmem:[%s3624_s1 + $0x54] sm:$0xf] }
 0x103   : > { %v3071_v15 = vsel %vm445_vm6, %v446_v38, %v444_v29  ;;  %v713_v40 = vsub.f32 1.0, %v712_v9  ;;  %v468_v21 = vsel %vm467_vm7, %v2959_v7, %v466_v30  ;;  %v478_v33 = vmul.f32 %v477_v17, %v2963_v8  ;;  %vm3677_vm5 = vmmov %vm3671_vm0 }
 0x104   : > { %815 = vst.msk [vmem:[#allocation2 + $0x28] sm:$0xf] %vm804_vm3, %v798_v32  ;;  %v3077_v48 = vadd.f32 1e-07, %v3071_v15  ;;  %v1873_v35 = vor.u32 %v2003_v53, %v1872_v36  ;;  %vm721_vm13 = vcmp.eq.f32.partialorder %v720_v5, 8.507059e+37  ;;  %v3112_v58 = vsel %vm469_vm8, %v470_v0, %v468_v21 }
 0x105   : > { %v714_v54 = vmul.f32 %v2136_v16, %v713_v40  ;;  %v1877_v22 = vor.u32 %v1999_v24, %v1874_v44  ;;  %vm497_vm14 = vcmp.gt.f32.partialorder %v2997_v14, 1.0  ;;  %v3118_v46 = vadd.f32 1e-07, %v3112_v58  ;;  %v1834_v0 = vld [vmem:[%s3624_s1 + $0x70] sm:$0xf0] }
 0x106   : > { %2137 = vrcp.f32 %v3077_v48  ;;  %v480_v28 = vsel %vm479_vm9, %v2963_v8, %v478_v33  ;;  %1414 = vmatpush.bf16.msrb.mxu2 %v1873_v35  ;;  %v1865_v14 = vor.u32 %v2002_v18, %v1864_v37  ;;  %v1998_v8 = vld [vmem:[%s3624_s1 + $0x94] sm:$0xf]  ;;  %vm701_vm0 = vweird.f32 %v3077_v48  ;;  %v3203_v35 = vld [vmem:[#allocation2 + $0x18] sm:$0xff] }
 0x107   : > { %v715_v49 = vadd.f32 %v2136_v16, %v714_v54  ;;  %v3127_v7 = vsel %vm481_vm1, %v482_v25, %v480_v28  ;;  %1463 = vmatpush.bf16.msrb.mxu3 %v1877_v22  ;;  %2139 = vrcp.f32 %v3118_v46  ;;  %v705_v57 = vand.u32 2147483647, %v3077_v48 }
 0x108   : > { %v3140_v56 = vadd.f32 1e-07, %v3127_v7  ;;  %1316 = vmatpush.bf16.msrb.mxu0 %v1865_v14  ;;  %v707_v61 = vand.u32 2147483648, %v3077_v48  ;;  %v1869_v38 = vor.u32 %v1998_v8, %v1866_v34  ;;  %v1841_v26 = vor.u32 %v1995_v60, %v1840_v59  ;;  %v1983_v59 = vld [vmem:[%s3624_s1 + $0x1c] sm:$0xf] }
 0x109   : > { %v719_v41 = vsel %vm3096_vm12, %v2136_v16, %v715_v49  ;;  %v1845_v3 = vor.u32 %v1991_v62, %v1842_v51  ;;  %v737_v16 = vand.u32 2147483648, %v3118_v46  ;;  %v1833_v20 = vor.u32 %v1994_v4, %v1832_v42  ;;  %v1986_v62 = vld [vmem:[%s3624_s1 + $0x2c] sm:$0xf0]  ;;  %v1802_v51 = vld [vmem:[%s3624_s1 + $0x30] sm:$0xf0] }
 0x10a   : > { %v724_v50 = vsel %vm721_vm13, %v723_v55, %v719_v41  ;;  %2141 = vrcp.f32 %v3140_v56  ;;  %1365 = vmatpush.bf16.msrb.mxu1 %v1869_v38  ;;  %v708_v9 = vor.u32 1.1754944e-38, %v707_v61  ;;  %1415 = vmatpush.bf16.msrb.mxu2 %v1841_v26  ;;  %v1837_v29 = vor.u32 %v1990_v27, %v1834_v0  ;;  %v2146_v55 = vld [vmem:[%s2310_s30 + $0x60] sm:$0xff]  ;;  %v2147_v41 = vld [vmem:[%s2310_s30 + $0x70] sm:$0xff] }
 0x10b   : > { %1912 = vmatmul.msk.bf16.gmra.mxu0 %vm3674_vm15, %v3114_v11  ;;  %v769_v45 = vsel %vm497_vm14, %v724_v50, 1.0  ;;  %1464 = vmatpush.bf16.msrb.mxu3 %v1845_v3  ;;  %vm496_vm8 = vcmp.gt.f32.partialorder %v3071_v15, 1.0  ;;  %vm706_vm9 = vcmp.eq.f32.partialorder %v705_v57, 8.507059e+37  ;;  %vm731_vm10 = vweird.f32 %v3118_v46  ;;  %v1810_v57 = vld [vmem:[%s3624_s1 + $0x38] sm:$0xf0]  ;;  %v3264_v26 = vld [vmem:[#allocation2 + $0x28] sm:$0xff] }
 0x10c   : > { %1920 = vmatmul.msk.bf16.gmra.mxu1 %vm3675_vm2, %v3114_v11  ;;  %1928 = vmatmul.msk.bf16.gmra.mxu2 %vm3676_vm4, %v3114_v11  ;;  %v2138_v52 = vpop.eup %2137  ;;  %v785_v6 = vmul.f32 %v2145_v10, %v769_v45  ;;  %v735_v40 = vand.u32 2147483647, %v3118_v46  ;;  %v738_v30 = vor.u32 1.1754944e-38, %v737_v16  ;;  %vm746_vm1 = vweird.f32 %v3140_v56  ;;  %v1800_v61 = vld [vmem:[%s3624_s1 + $0x10] sm:$0xf]  ;;  %v3297_v27 = vld [vmem:[%s3625_s2] sm:$0xff] }
 0x10d   : > { %1936 = vmatmul.msk.bf16.gmra.mxu3 %vm3677_vm5, %v3114_v11  ;;  %v697_v39 = vmul.f32 %v2138_v52, %v3077_v48  ;;  %vm702_vm6 = vweird.f32 %v2138_v52  ;;  %v2140_v43 = vpop.eup %2139  ;;  %1317 = vmatpush.bf16.msrb.mxu0 %v1833_v20  ;;  %v752_v24 = vand.u32 2147483648, %v3140_v56  ;;  %v750_v31 = vand.u32 2147483647, %v3140_v56  ;;  %v1982_v38 = vld [vmem:[%s3624_s1 + $0x14] sm:$0xf] }
 0x10e   : > { %v801_v12 = vpack.c.bf16 %v785_v6, %v785_v6  ;;  %vm3182_vm7 = vmor %vm701_vm0, %vm702_vm6  ;;  %v727_v5 = vmul.f32 %v2140_v43, %v3118_v46  ;;  %vm732_vm11 = vweird.f32 %v2140_v43  ;;  %1366 = vmatpush.bf16.msrb.mxu1 %v1837_v29  ;;  %vm736_vm14 = vcmp.eq.f32.partialorder %v735_v40, 8.507059e+37  ;;  %v3230_v6 = vld [vmem:[#allocation2 + $0x20] sm:$0xff] }
 0x10f   : > { %v698_v19 = vsub.f32 1.0, %v697_v39  ;;  %vm3197_vm12 = vmor %vm731_vm10, %vm732_vm11  ;;  %vm498_vm15 = vcmp.gt.f32.partialorder %v3112_v58, 1.0  ;;  %v753_v22 = vor.u32 1.1754944e-38, %v752_v24  ;;  %vm751_vm5 = vcmp.eq.f32.partialorder %v750_v31, 8.507059e+37  ;;  %v1987_v39 = vld [vmem:[%s3624_s1 + $0x34] sm:$0xf0] }
 0x110   : > { %818 = vst.msk [vmem:[#allocation2 + $0x34] sm:$0xf] %vm804_vm3, %v801_v12  ;;  %v2142_v23 = vpop.eup %2141  ;;  %v728_v13 = vsub.f32 1.0, %v727_v5  ;;  %vm3684_vm0 = vmmov %vm3676_vm4  ;;  %v1813_v12 = vor.u32 %v1983_v59, %v1810_v57  ;;  %v1805_v42 = vor.u32 %v1982_v38, %v1802_v51  ;;  %v3317_v5 = vperm.slane %v3297_v27, 2 }
 0x111   : > { %v699_v2 = vmul.f32 %v2138_v52, %v698_v19  ;;  %v742_v17 = vmul.f32 %v2142_v23, %v3140_v56  ;;  %vm747_vm13 = vweird.f32 %v2142_v23  ;;  %vm3685_vm6 = vmmov %vm3684_vm0  ;;  %v2148_v56 = vld [vmem:[%s2310_s30 + $0x78] sm:$0xff]  ;;  %v1801_v19 = vor.u32 %v1986_v62, %v1800_v61 }
 0x112   : > { %v729_v53 = vmul.f32 %v2140_v43, %v728_v13  ;;  %vm3210_vm2 = vmor %vm746_vm1, %vm747_vm13  ;;  %1465 = vmatpush.bf16.msrb.mxu3 %v1813_v12  ;;  %1367 = vmatpush.bf16.msrb.mxu1 %v1805_v42  ;;  %v3322_v29 = vperm.slane %v3297_v27, 3 }
 0x113   : > { %v700_v1 = vadd.f32 %v2138_v52, %v699_v2  ;;  %v743_v44 = vsub.f32 1.0, %v742_v17  ;;  %vm3688_vm10 = vmmov %vm3684_vm0  ;;  %1318 = vmatpush.bf16.msrb.mxu0 %v1801_v19  ;;  %v3304_v2 = vperm.slane %v3297_v27, 1 }
 0x114   : > { %v730_v33 = vadd.f32 %v2140_v43, %v729_v53  ;;  %vm3689_vm11 = vmmov %vm3684_vm0 }
 0x115   : > { %v704_v48 = vsel %vm3182_vm7, %v2138_v52, %v700_v1  ;;  %v744_v37 = vmul.f32 %v2142_v23, %v743_v44  ;;  %vm499_vm7 = vcmp.gt.f32.partialorder %v3127_v7, 1.0  ;;  %vm3690_vm1 = vmmov %vm3684_vm0  ;;  %v1808_v7 = vld [vmem:[%s3624_s1 + $0x18] sm:$0xf] }
 0x116   : > { %v709_v36 = vsel %vm706_vm9, %v708_v9, %v704_v48  ;;  %v734_v18 = vsel %vm3197_vm12, %v2140_v43, %v730_v33  ;;  %vm3687_vm9 = vmmov %vm3684_vm0  ;;  %v1809_v60 = vor.u32 %v1987_v39, %v1808_v7  ;;  %v3300_v43 = vperm.slane %v3297_v27, 0 }
 0x117   : > { %v768_v54 = vsel %vm496_vm8, %v709_v36, 1.0  ;;  %v739_v46 = vsel %vm736_vm14, %v738_v30, %v734_v18  ;;  %v745_v28 = vadd.f32 %v2142_v23, %v744_v37  ;;  %vm3686_vm8 = vmmov %vm3684_vm0 }
 0x118   : > { %v784_v21 = vmul.f32 %v2146_v55, %v768_v54  ;;  %v770_v58 = vsel %vm498_vm15, %v739_v46, 1.0  ;;  %1416 = vmatpush.bf16.msrb.mxu2 %v1809_v60  ;;  %vm3692_vm12 = vmmov %vm3684_vm0 }
 0x119   : > { %v786_v14 = vmul.f32 %v2147_v41, %v770_v58  ;;  %v749_v50 = vsel %vm3210_vm2, %v2142_v23, %v745_v28  ;;  %vm3693_vm13 = vmmov %vm3684_vm0 }
 0x11a   : > { %v800_v15 = vpack.c.bf16 %v784_v21, %v784_v21  ;;  %v754_v8 = vsel %vm751_vm5, %v753_v22, %v749_v50  ;;  %vm3694_vm14 = vmmov %vm3684_vm0 }
 0x11b   : > { %1913 = vmatmul.msk.bf16.gmra.mxu0 %vm3676_vm4, %v3203_v35  ;;  %v802_v52 = vpack.c.bf16 %v786_v14, %v786_v14  ;;  %v771_v45 = vsel %vm499_vm7, %v754_v8, 1.0  ;;  %vm3695_vm15 = vmmov %vm3684_vm0 }
 0x11c   : > { %1921 = vmatmul.msk.bf16.gmra.mxu1 %vm3684_vm0, %v3203_v35  ;;  %1929 = vmatmul.msk.bf16.gmra.mxu2 %vm3685_vm6, %v3203_v35  ;;  %817 = vst.msk [vmem:[#allocation2 + $0x30] sm:$0xf] %vm804_vm3, %v800_v15  ;;  %v787_v34 = vmul.f32 %v2148_v56, %v771_v45  ;;  %vm3696_vm2 = vmmov %vm3684_vm0 }
 0x11d   : > { %1937 = vmatmul.msk.bf16.gmra.mxu3 %vm3686_vm8, %v3203_v35  ;;  %819 = vst.msk [vmem:[#allocation2 + $0x38] sm:$0xf] %vm804_vm3, %v802_v52  ;;  %vm3697_vm4 = vmmov %vm3684_vm0 }
 0x11e   : > { %v803_v10 = vpack.c.bf16 %v787_v34, %v787_v34  ;;  %vm3698_vm5 = vmmov %vm3684_vm0 }
 0x11f   : > { %vm3699_vm6 = vmmov %vm3684_vm0 }
 0x120   : > { %820 = vst.msk [vmem:[#allocation2 + $0x3c] sm:$0xf] %vm804_vm3, %v803_v10  ;;  %vm3691_vm3 = vmmov %vm3684_vm0 }
 0x121   : > { %vm3700_vm7 = vmmov %vm3684_vm0 }
 0x122   : > { %vm3701_vm8 = vmmov %vm3684_vm0 }
 0x123   : > { %v3274_v3 = vld [vmem:[#allocation2 + $0x30] sm:$0xff] }
 0x127   : > { %v3284_v4 = vld [vmem:[#allocation2 + $0x38] sm:$0xff] }
 0x12b   : > { %1914 = vmatmul.msk.bf16.gmra.mxu0 %vm3687_vm9, %v3230_v6  ;;  %vm3702_vm9 = vmmov %vm3684_vm0 }
 0x12c   : > { %1922 = vmatmul.msk.bf16.gmra.mxu1 %vm3688_vm10, %v3230_v6  ;;  %1930 = vmatmul.msk.bf16.gmra.mxu2 %vm3689_vm11, %v3230_v6  ;;  %vm3703_vm10 = vmmov %vm3684_vm0 }
 0x12d   : > { %1938 = vmatmul.msk.bf16.gmra.mxu3 %vm3690_vm1, %v3230_v6  ;;  %vm3704_vm11 = vmmov %vm3684_vm0 }
 0x12e   : > { %vm3705_vm1 = vmmov %vm3684_vm0 }
 0x13b   : > { %1915 = vmatmul.msk.bf16.gmra.mxu0 %vm3691_vm3, %v3264_v26  ;;  %vm3706_vm3 = vmmov %vm3684_vm0 }
 0x13c   : > { %1923 = vmatmul.msk.bf16.gmra.mxu1 %vm3692_vm12, %v3264_v26  ;;  %1931 = vmatmul.msk.bf16.gmra.mxu2 %vm3693_vm13, %v3264_v26  ;;  %vm3707_vm12 = vmmov %vm3684_vm0 }
 0x13d   : > { %1939 = vmatmul.msk.bf16.gmra.mxu3 %vm3694_vm14, %v3264_v26  ;;  %vm3708_vm13 = vmmov %vm3684_vm0 }
 0x13e   : > { %vm3709_vm14 = vmmov %vm3684_vm0 }
 0x14b   : > { %1916 = vmatmul.msk.bf16.gmra.mxu0 %vm3695_vm15, %v3274_v3  ;;  %vm3710_vm15 = vmmov %vm3684_vm0 }
 0x14c   : > { %1924 = vmatmul.msk.bf16.gmra.mxu1 %vm3696_vm2, %v3274_v3  ;;  %1932 = vmatmul.msk.bf16.gmra.mxu2 %vm3697_vm4, %v3274_v3  ;;  %vm3711_vm2 = vmmov %vm3684_vm0 }
 0x14d   : > { %1940 = vmatmul.msk.bf16.gmra.mxu3 %vm3698_vm5, %v3274_v3  ;;  %vm3712_vm4 = vmmov %vm3684_vm0 }
 0x14e   : > { %vm3713_vm5 = vmmov %vm3684_vm0 }
 0x15b   : > { %1917 = vmatmul.msk.bf16.gmra.mxu0 %vm3684_vm0, %v3284_v4 }
 0x15c   : > { %1925 = vmatmul.msk.bf16.gmra.mxu1 %vm3699_vm6, %v3284_v4  ;;  %1933 = vmatmul.msk.bf16.gmra.mxu2 %vm3700_vm7, %v3284_v4  ;;  %vm3714_vm6 = vmmov %vm3684_vm0 }
 0x15d   : > { %1941 = vmatmul.msk.bf16.gmra.mxu3 %vm3701_vm8, %v3284_v4  ;;  %vm3715_vm7 = vmmov %vm3684_vm0 }
 0x15e   : > { %vm3716_vm8 = vmmov %vm3684_vm0 }
 0x168   : > { %v1124_v16 = vpop.f32.mrf.mxu0 }
 0x169   : > { %v1125_v20 = vadd.f32 %v1124_v16, %v3300_v43  ;;  %v1173_v0 = vpop.f32.mrf.mxu1 }
 0x16a   : > { %v1174_v32 = vadd.f32 %v1173_v0, %v3304_v2 }
 0x16b   : > { %1942 = vmatmul.msk.bf16.vlgmr.msrb.gmra.mxu0 %vm3702_vm9, %v2903_v47  ;;  %vm3717_vm9 = vmmov %vm3684_vm0 }
 0x16c   : > { %v1507_v9 = vpack.c.bf16 %v1174_v32, %v1125_v20  ;;  %1950 = vmatmul.msk.bf16.vlgmr.msrb.gmra.mxu1 %vm3703_vm10, %v2903_v47  ;;  %1958 = vmatmul.msk.bf16.vlgmr.msrb.gmra.mxu2 %vm3704_vm11, %v2903_v47  ;;  %vm3718_vm10 = vmmov %vm3684_vm0 }
 0x16d   : > { %1966 = vmatmul.msk.bf16.vlgmr.msrb.gmra.mxu3 %vm3705_vm1, %v2903_v47  ;;  %vm3719_vm11 = vmmov %vm3684_vm0 }
 0x16e   : > { %1571 = vst [vmem:[%s3324_s6] sm:$0xff] %v1507_v9  ;;  %vm3720_vm1 = vmmov %vm3684_vm0 }
 0x16f   : > { %v1222_v1 = vpop.f32.mrf.mxu2 }
 0x170   : > { %v1223_v23 = vadd.f32 %v1222_v1, %v3317_v5  ;;  %v1271_v13 = vpop.f32.mrf.mxu3  ;;  %v1126_v40 = vpop.f32.mrf.mxu0 }
 0x171   : > { %v1272_v48 = vadd.f32 %v1271_v13, %v3322_v29  ;;  %v1127_v30 = vadd.f32 %v1126_v40, %v3300_v43  ;;  %v1175_v17 = vpop.f32.mrf.mxu1 }
 0x172   : > { %v1176_v47 = vadd.f32 %v1175_v17, %v3304_v2 }
 0x173   : > { %v1508_v36 = vpack.c.bf16 %v1272_v48, %v1223_v23 }
 0x174   : > { %v1511_v53 = vpack.c.bf16 %v1176_v47, %v1127_v30 }
 0x175   : > { %1572 = vst [vmem:[%s3324_s6 + $0x8] sm:$0xff] %v1508_v36 }
 0x176   : > { %1575 = vst [vmem:[%s3324_s6 + $0x20] sm:$0xff] %v1511_v53 }
 0x177   : > { %v1224_v24 = vpop.f32.mrf.mxu2 }
 0x178   : > { %v1225_v54 = vadd.f32 %v1224_v24, %v3317_v5  ;;  %v1273_v25 = vpop.f32.mrf.mxu3  ;;  %v1129_v44 = vpop.f32.mrf.mxu0 }
 0x179   : > { %v1274_v31 = vadd.f32 %v1273_v25, %v3322_v29  ;;  %v1130_v55 = vadd.f32 %v1129_v44, %v3300_v43  ;;  %v1178_v21 = vpop.f32.mrf.mxu1 }
 0x17a   : > { %v1179_v33 = vadd.f32 %v1178_v21, %v3304_v2 }
 0x17b   : > { %v1512_v37 = vpack.c.bf16 %v1274_v31, %v1225_v54  ;;  %1943 = vmatmul.msk.bf16.gmra.mxu0 %vm3706_vm3, %v2999_v63  ;;  %vm3721_vm3 = vmmov %vm3684_vm0 }
 0x17c   : > { %v1515_v15 = vpack.c.bf16 %v1179_v33, %v1130_v55  ;;  %1951 = vmatmul.msk.bf16.gmra.mxu1 %vm3707_vm12, %v2999_v63  ;;  %1959 = vmatmul.msk.bf16.gmra.mxu2 %vm3708_vm13, %v2999_v63  ;;  %vm3722_vm12 = vmmov %vm3684_vm0 }
 0x17d   : > { %1576 = vst [vmem:[%s3324_s6 + $0x28] sm:$0xff] %v1512_v37  ;;  %1967 = vmatmul.msk.bf16.gmra.mxu3 %vm3709_vm14, %v2999_v63  ;;  %vm3723_vm13 = vmmov %vm3684_vm0 }
 0x17e   : > { %1579 = vst [vmem:[%s3324_s6 + $0x40] sm:$0xff] %v1515_v15  ;;  %vm3724_vm14 = vmmov %vm3684_vm0 }
 0x17f   : > { %v1227_v18 = vpop.f32.mrf.mxu2 }
 0x180   : > { %v1228_v49 = vadd.f32 %v1227_v18, %v3317_v5  ;;  %v1276_v22 = vpop.f32.mrf.mxu3  ;;  %v1131_v46 = vpop.f32.mrf.mxu0 }
 0x181   : > { %v1277_v28 = vadd.f32 %v1276_v22, %v3322_v29  ;;  %v1132_v58 = vadd.f32 %v1131_v46, %v3300_v43  ;;  %v1180_v41 = vpop.f32.mrf.mxu1 }
 0x182   : > { %v1181_v14 = vadd.f32 %v1180_v41, %v3304_v2 }
 0x183   : > { %v1516_v50 = vpack.c.bf16 %v1277_v28, %v1228_v49 }
 0x184   : > { %v1519_v8 = vpack.c.bf16 %v1181_v14, %v1132_v58 }
 0x185   : > { %1580 = vst [vmem:[%s3324_s6 + $0x48] sm:$0xff] %v1516_v50 }
 0x186   : > { %1583 = vst [vmem:[%s3324_s6 + $0x60] sm:$0xff] %v1519_v8 }
 0x187   : > { %v1229_v63 = vpop.f32.mrf.mxu2 }
 0x188   : > { %v1230_v52 = vadd.f32 %v1229_v63, %v3317_v5  ;;  %v1278_v45 = vpop.f32.mrf.mxu3  ;;  %v1134_v56 = vpop.f32.mrf.mxu0 }
 0x189   : > { %v1279_v34 = vadd.f32 %v1278_v45, %v3322_v29  ;;  %v1135_v10 = vadd.f32 %v1134_v56, %v3300_v43  ;;  %v1183_v7 = vpop.f32.mrf.mxu1 }
 0x18a   : > { %v1184_v39 = vadd.f32 %v1183_v7, %v3304_v2 }
 0x18b   : > { %v1520_v59 = vpack.c.bf16 %v1279_v34, %v1230_v52  ;;  %1944 = vmatmul.msk.bf16.gmra.mxu0 %vm3710_vm15, %v3114_v11  ;;  %vm3725_vm15 = vmmov %vm3684_vm0 }
 0x18c   : > { %v1523_v60 = vpack.c.bf16 %v1184_v39, %v1135_v10  ;;  %1952 = vmatmul.msk.bf16.gmra.mxu1 %vm3711_vm2, %v3114_v11  ;;  %1960 = vmatmul.msk.bf16.gmra.mxu2 %vm3712_vm4, %v3114_v11  ;;  %vm3726_vm2 = vmmov %vm3684_vm0 }
 0x18d   : > { %1584 = vst [vmem:[%s3324_s6 + $0x68] sm:$0xff] %v1520_v59  ;;  %1968 = vmatmul.msk.bf16.gmra.mxu3 %vm3713_vm5, %v3114_v11  ;;  %vm3727_vm4 = vmmov %vm3684_vm0 }
 0x18e   : > { %1587 = vst [vmem:[%s3324_s6 + $0x80] sm:$0xff] %v1523_v60  ;;  %vm3728_vm5 = vmmov %vm3684_vm0 }
 0x18f   : > { %v1232_v57 = vpop.f32.mrf.mxu2 }
 0x190   : > { %v1233_v61 = vadd.f32 %v1232_v57, %v3317_v5  ;;  %v1281_v62 = vpop.f32.mrf.mxu3  ;;  %v1136_v12 = vpop.f32.mrf.mxu0 }
 0x191   : > { %v1282_v19 = vadd.f32 %v1281_v62, %v3322_v29  ;;  %v1137_v38 = vadd.f32 %v1136_v12, %v3300_v43  ;;  %v1185_v51 = vpop.f32.mrf.mxu1 }
 0x192   : > { %v1186_v42 = vadd.f32 %v1185_v51, %v3304_v2 }
 0x193   : > { %v1524_v16 = vpack.c.bf16 %v1282_v19, %v1233_v61 }
 0x194   : > { %v1527_v20 = vpack.c.bf16 %v1186_v42, %v1137_v38 }
 0x195   : > { %1588 = vst [vmem:[%s3324_s6 + $0x88] sm:$0xff] %v1524_v16 }
 0x196   : > { %1591 = vst [vmem:[%s3324_s6 + $0xa0] sm:$0xff] %v1527_v20 }
 0x197   : > { %v1234_v11 = vpop.f32.mrf.mxu2 }
 0x198   : > { %v1235_v0 = vadd.f32 %v1234_v11, %v3317_v5  ;;  %v1283_v32 = vpop.f32.mrf.mxu3  ;;  %v1139_v9 = vpop.f32.mrf.mxu0 }
 0x199   : > { %v1284_v1 = vadd.f32 %v1283_v32, %v3322_v29  ;;  %v1140_v23 = vadd.f32 %v1139_v9, %v3300_v43  ;;  %v1188_v13 = vpop.f32.mrf.mxu1 }
 0x19a   : > { %v1189_v40 = vadd.f32 %v1188_v13, %v3304_v2 }
 0x19b   : > { %v1528_v48 = vpack.c.bf16 %v1284_v1, %v1235_v0  ;;  %1945 = vmatmul.msk.bf16.gmra.mxu0 %vm3684_vm0, %v3203_v35 }
 0x19c   : > { %v1531_v30 = vpack.c.bf16 %v1189_v40, %v1140_v23  ;;  %1953 = vmatmul.msk.bf16.gmra.mxu1 %vm3714_vm6, %v3203_v35  ;;  %1961 = vmatmul.msk.bf16.gmra.mxu2 %vm3715_vm7, %v3203_v35  ;;  %vm3729_vm6 = vmmov %vm3684_vm0 }
 0x19d   : > { %1592 = vst [vmem:[%s3324_s6 + $0xa8] sm:$0xff] %v1528_v48  ;;  %1969 = vmatmul.msk.bf16.gmra.mxu3 %vm3716_vm8, %v3203_v35  ;;  %vm3730_vm7 = vmmov %vm3684_vm0 }
 0x19e   : > { %1595 = vst [vmem:[%s3324_s6 + $0xc0] sm:$0xff] %v1531_v30  ;;  %vm3731_vm8 = vmmov %vm3684_vm0 }
 0x19f   : > { %v1237_v17 = vpop.f32.mrf.mxu2 }
 0x1a0   : > { %v1238_v47 = vadd.f32 %v1237_v17, %v3317_v5  ;;  %v1286_v36 = vpop.f32.mrf.mxu3  ;;  %v1141_v53 = vpop.f32.mrf.mxu0 }
 0x1a1   : > { %v1287_v24 = vadd.f32 %v1286_v36, %v3322_v29  ;;  %v1142_v54 = vadd.f32 %v1141_v53, %v3300_v43  ;;  %v1190_v25 = vpop.f32.mrf.mxu1 }
 0x1a2   : > { %v1191_v44 = vadd.f32 %v1190_v25, %v3304_v2 }
 0x1a3   : > { %v1532_v31 = vpack.c.bf16 %v1287_v24, %v1238_v47 }
 0x1a4   : > { %v1535_v55 = vpack.c.bf16 %v1191_v44, %v1142_v54 }
 0x1a5   : > { %1596 = vst [vmem:[%s3324_s6 + $0xc8] sm:$0xff] %v1532_v31 }
 0x1a6   : > { %1599 = vst [vmem:[%s3324_s6 + $0xe0] sm:$0xff] %v1535_v55 }
 0x1a7   : > { %v1239_v35 = vpop.f32.mrf.mxu2 }
 0x1a8   : > { %v1240_v21 = vadd.f32 %v1239_v35, %v3317_v5  ;;  %v1288_v33 = vpop.f32.mrf.mxu3  ;;  %v1144_v37 = vpop.f32.mrf.mxu0 }
 0x1a9   : > { %v1289_v15 = vadd.f32 %v1288_v33, %v3322_v29  ;;  %v1145_v18 = vadd.f32 %v1144_v37, %v3300_v43  ;;  %v1193_v49 = vpop.f32.mrf.mxu1 }
 0x1aa   : > { %v1194_v22 = vadd.f32 %v1193_v49, %v3304_v2 }
 0x1ab   : > { %v1536_v46 = vpack.c.bf16 %v1289_v15, %v1240_v21  ;;  %1946 = vmatmul.msk.bf16.gmra.mxu0 %vm3717_vm9, %v3230_v6 }
 0x1ac   : > { %v1539_v28 = vpack.c.bf16 %v1194_v22, %v1145_v18  ;;  %1954 = vmatmul.msk.bf16.gmra.mxu1 %vm3718_vm10, %v3230_v6  ;;  %1962 = vmatmul.msk.bf16.gmra.mxu2 %vm3719_vm11, %v3230_v6 }
 0x1ad   : > { %1600 = vst [vmem:[%s3324_s6 + $0xe8] sm:$0xff] %v1536_v46  ;;  %1970 = vmatmul.msk.bf16.gmra.mxu3 %vm3720_vm1, %v3230_v6 }
 0x1ae   : > { %1603 = vst [vmem:[%s3324_s6 + $0x100] sm:$0xff] %v1539_v28 }
 0x1af   : > { %v1242_v58 = vpop.f32.mrf.mxu2 }
 0x1b0   : > { %v1243_v41 = vadd.f32 %v1242_v58, %v3317_v5  ;;  %v1291_v14 = vpop.f32.mrf.mxu3  ;;  %v1146_v50 = vpop.f32.mrf.mxu0 }
 0x1b1   : > { %v1292_v8 = vadd.f32 %v1291_v14, %v3322_v29  ;;  %v1147_v63 = vadd.f32 %v1146_v50, %v3300_v43  ;;  %v1195_v52 = vpop.f32.mrf.mxu1 }
 0x1b2   : > { %v1196_v45 = vadd.f32 %v1195_v52, %v3304_v2 }
 0x1b3   : > { %v1540_v56 = vpack.c.bf16 %v1292_v8, %v1243_v41 }
 0x1b4   : > { %v1543_v34 = vpack.c.bf16 %v1196_v45, %v1147_v63 }
 0x1b5   : > { %1604 = vst [vmem:[%s3324_s6 + $0x108] sm:$0xff] %v1540_v56 }
 0x1b6   : > { %1607 = vst [vmem:[%s3324_s6 + $0x120] sm:$0xff] %v1543_v34 }
 0x1b7   : > { %v1244_v6 = vpop.f32.mrf.mxu2 }
 0x1b8   : > { %v1245_v10 = vadd.f32 %v1244_v6, %v3317_v5  ;;  %v1293_v7 = vpop.f32.mrf.mxu3  ;;  %v1149_v39 = vpop.f32.mrf.mxu0 }
 0x1b9   : > { %v1294_v59 = vadd.f32 %v1293_v7, %v3322_v29  ;;  %v1150_v60 = vadd.f32 %v1149_v39, %v3300_v43  ;;  %v1198_v57 = vpop.f32.mrf.mxu1  ;;  %v3473_v7 = vperm.slane %v3297_v27, 4 }
 0x1ba   : > { %v1199_v61 = vadd.f32 %v1198_v57, %v3304_v2 }
 0x1bb   : > { %v1544_v62 = vpack.c.bf16 %v1294_v59, %v1245_v10  ;;  %1947 = vmatmul.msk.bf16.gmra.mxu0 %vm3721_vm3, %v3264_v26 }
 0x1bc   : > { %v1547_v12 = vpack.c.bf16 %v1199_v61, %v1150_v60  ;;  %1955 = vmatmul.msk.bf16.gmra.mxu1 %vm3722_vm12, %v3264_v26  ;;  %1963 = vmatmul.msk.bf16.gmra.mxu2 %vm3723_vm13, %v3264_v26 }
 0x1bd   : > { %1608 = vst [vmem:[%s3324_s6 + $0x128] sm:$0xff] %v1544_v62  ;;  %1971 = vmatmul.msk.bf16.gmra.mxu3 %vm3724_vm14, %v3264_v26 }
 0x1be   : > { %1611 = vst [vmem:[%s3324_s6 + $0x140] sm:$0xff] %v1547_v12 }
 0x1bf   : > { %v1247_v19 = vpop.f32.mrf.mxu2 }
 0x1c0   : > { %v1248_v38 = vadd.f32 %v1247_v19, %v3317_v5  ;;  %v1296_v51 = vpop.f32.mrf.mxu3  ;;  %v1151_v42 = vpop.f32.mrf.mxu0 }
 0x1c1   : > { %v1297_v16 = vadd.f32 %v1296_v51, %v3322_v29  ;;  %v1152_v20 = vadd.f32 %v1151_v42, %v3300_v43  ;;  %v1200_v11 = vpop.f32.mrf.mxu1  ;;  %v3488_v51 = vperm.slane %v3297_v27, 7 }
 0x1c2   : > { %v1201_v0 = vadd.f32 %v1200_v11, %v3304_v2 }
 0x1c3   : > { %v1548_v32 = vpack.c.bf16 %v1297_v16, %v1248_v38  ;;  %v3484_v38 = vperm.slane %v3297_v27, 6 }
 0x1c4   : > { %v1551_v9 = vpack.c.bf16 %v1201_v0, %v1152_v20 }
 0x1c5   : > { %1612 = vst [vmem:[%s3324_s6 + $0x148] sm:$0xff] %v1548_v32 }
 0x1c6   : > { %1615 = vst [vmem:[%s3324_s6 + $0x160] sm:$0xff] %v1551_v9 }
 0x1c7   : > { %v1249_v26 = vpop.f32.mrf.mxu2 }
 0x1c8   : > { %v1250_v1 = vadd.f32 %v1249_v26, %v3317_v5  ;;  %v1298_v23 = vpop.f32.mrf.mxu3  ;;  %v1154_v13 = vpop.f32.mrf.mxu0 }
 0x1c9   : > { %v1299_v40 = vadd.f32 %v1298_v23, %v3322_v29  ;;  %v1155_v48 = vadd.f32 %v1154_v13, %v3300_v43  ;;  %v1203_v30 = vpop.f32.mrf.mxu1 }
 0x1ca   : > { %v1204_v17 = vadd.f32 %v1203_v30, %v3304_v2 }
 0x1cb   : > { %v1552_v47 = vpack.c.bf16 %v1299_v40, %v1250_v1  ;;  %1948 = vmatmul.msk.bf16.gmra.mxu0 %vm3725_vm15, %v3274_v3 }
 0x1cc   : > { %v1555_v36 = vpack.c.bf16 %v1204_v17, %v1155_v48  ;;  %1956 = vmatmul.msk.bf16.gmra.mxu1 %vm3726_vm2, %v3274_v3  ;;  %1964 = vmatmul.msk.bf16.gmra.mxu2 %vm3727_vm4, %v3274_v3 }
 0x1cd   : > { %1616 = vst [vmem:[%s3324_s6 + $0x168] sm:$0xff] %v1552_v47  ;;  %1972 = vmatmul.msk.bf16.gmra.mxu3 %vm3728_vm5, %v3274_v3 }
 0x1ce   : > { %1619 = vst [vmem:[%s3324_s6 + $0x180] sm:$0xff] %v1555_v36 }
 0x1cf   : > { %v1252_v53 = vpop.f32.mrf.mxu2 }
 0x1d0   : > { %v1253_v24 = vadd.f32 %v1252_v53, %v3317_v5  ;;  %v1301_v54 = vpop.f32.mrf.mxu3  ;;  %v1156_v25 = vpop.f32.mrf.mxu0 }
 0x1d1   : > { %v1302_v44 = vadd.f32 %v1301_v54, %v3322_v29  ;;  %v1157_v31 = vadd.f32 %v1156_v25, %v3300_v43  ;;  %v1205_v55 = vpop.f32.mrf.mxu1 }
 0x1d2   : > { %v1206_v35 = vadd.f32 %v1205_v55, %v3304_v2 }
 0x1d3   : > { %v1556_v21 = vpack.c.bf16 %v1302_v44, %v1253_v24 }
 0x1d4   : > { %v1559_v33 = vpack.c.bf16 %v1206_v35, %v1157_v31 }
 0x1d5   : > { %1620 = vst [vmem:[%s3324_s6 + $0x188] sm:$0xff] %v1556_v21 }
 0x1d6   : > { %1623 = vst [vmem:[%s3324_s6 + $0x1a0] sm:$0xff] %v1559_v33 }
 0x1d7   : > { %v1254_v3 = vpop.f32.mrf.mxu2 }
 0x1d8   : > { %v1255_v37 = vadd.f32 %v1254_v3, %v3317_v5  ;;  %v1303_v15 = vpop.f32.mrf.mxu3  ;;  %v1159_v18 = vpop.f32.mrf.mxu0 }
 0x1d9   : > { %v1304_v49 = vadd.f32 %v1303_v15, %v3322_v29  ;;  %v1160_v22 = vadd.f32 %v1159_v18, %v3300_v43  ;;  %v1208_v46 = vpop.f32.mrf.mxu1 }
 0x1da   : > { %v1209_v28 = vadd.f32 %v1208_v46, %v3304_v2 }
 0x1db   : > { %v1560_v58 = vpack.c.bf16 %v1304_v49, %v1255_v37  ;;  %1949 = vmatmul.msk.bf16.gmra.mxu0 %vm3684_vm0, %v3284_v4 }
 0x1dc   : > { %v1563_v41 = vpack.c.bf16 %v1209_v28, %v1160_v22  ;;  %1957 = vmatmul.msk.bf16.gmra.mxu1 %vm3729_vm6, %v3284_v4  ;;  %1965 = vmatmul.msk.bf16.gmra.mxu2 %vm3730_vm7, %v3284_v4 }
 0x1dd   : > { %1624 = vst [vmem:[%s3324_s6 + $0x1a8] sm:$0xff] %v1560_v58  ;;  %1973 = vmatmul.msk.bf16.gmra.mxu3 %vm3731_vm8, %v3284_v4  ;;  %v3477_v4 = vperm.slane %v3297_v27, 5 }
 0x1de   : > { %1627 = vst [vmem:[%s3324_s6 + $0x1c0] sm:$0xff] %v1563_v41 }
 0x1df   : > { %v1257_v14 = vpop.f32.mrf.mxu2 }
 0x1e0   : > { %v1258_v50 = vadd.f32 %v1257_v14, %v3317_v5  ;;  %v1306_v8 = vpop.f32.mrf.mxu3  ;;  %v1161_v63 = vpop.f32.mrf.mxu0 }
 0x1e1   : > { %v1307_v52 = vadd.f32 %v1306_v8, %v3322_v29  ;;  %v1162_v45 = vadd.f32 %v1161_v63, %v3300_v43  ;;  %v1210_v56 = vpop.f32.mrf.mxu1 }
 0x1e2   : > { %v1211_v34 = vadd.f32 %v1210_v56, %v3304_v2 }
 0x1e3   : > { %v1564_v6 = vpack.c.bf16 %v1307_v52, %v1258_v50 }
 0x1e4   : > { %v1567_v10 = vpack.c.bf16 %v1211_v34, %v1162_v45 }
 0x1e5   : > { %1628 = vst [vmem:[%s3324_s6 + $0x1c8] sm:$0xff] %v1564_v6 }
 0x1e6   : > { %1631 = vst [vmem:[%s3324_s6 + $0x1e0] sm:$0xff] %v1567_v10 }
 0x1e7   : > { %v1259_v39 = vpop.f32.mrf.mxu2 }
 0x1e8   : > { %v1260_v59 = vadd.f32 %v1259_v39, %v3317_v5  ;;  %v1308_v60 = vpop.f32.mrf.mxu3  ;;  %v1320_v43 = vpop.f32.mrf.mxu0 }
 0x1e9   : > { %v1309_v57 = vadd.f32 %v1308_v60, %v3322_v29  ;;  %v1321_v2 = vadd.f32 %v1320_v43, %v3473_v7  ;;  %v1369_v61 = vpop.f32.mrf.mxu1 }
 0x1ea   : > { %v1370_v62 = vadd.f32 %v1369_v61, %v3477_v4 }
 0x1eb   : > { %v1568_v12 = vpack.c.bf16 %v1309_v57, %v1260_v59 }
 0x1ec   : > { %v1509_v19 = vpack.c.bf16 %v1370_v62, %v1321_v2 }
 0x1ed   : > { %1632 = vst [vmem:[%s3324_s6 + $0x1e8] sm:$0xff] %v1568_v12 }
 0x1ee   : > { %1573 = vst [vmem:[%s3324_s6 + $0x10] sm:$0xff] %v1509_v19 }
 0x1ef   : > { %v1418_v5 = vpop.f32.mrf.mxu2 }
 0x1f0   : > { %v1419_v29 = vadd.f32 %v1418_v5, %v3484_v38  ;;  %v1467_v42 = vpop.f32.mrf.mxu3  ;;  %v1322_v16 = vpop.f32.mrf.mxu0 }
 0x1f1   : > { %v1468_v20 = vadd.f32 %v1467_v42, %v3488_v51  ;;  %v1323_v11 = vadd.f32 %v1322_v16, %v3473_v7  ;;  %v1371_v0 = vpop.f32.mrf.mxu1 }
 0x1f2   : > { %v1372_v32 = vadd.f32 %v1371_v0, %v3477_v4 }
 0x1f3   : > { %v1510_v9 = vpack.c.bf16 %v1468_v20, %v1419_v29 }
 0x1f4   : > { %v1513_v26 = vpack.c.bf16 %v1372_v32, %v1323_v11 }
 0x1f5   : > { %1574 = vst [vmem:[%s3324_s6 + $0x18] sm:$0xff] %v1510_v9 }
 0x1f6   : > { %1577 = vst [vmem:[%s3324_s6 + $0x30] sm:$0xff] %v1513_v26 }
 0x1f7   : > { %v1420_v27 = vpop.f32.mrf.mxu2 }
 0x1f8   : > { %v1421_v1 = vadd.f32 %v1420_v27, %v3484_v38  ;;  %v1469_v23 = vpop.f32.mrf.mxu3  ;;  %v1325_v13 = vpop.f32.mrf.mxu0 }
 0x1f9   : > { %v1470_v40 = vadd.f32 %v1469_v23, %v3488_v51  ;;  %v1326_v48 = vadd.f32 %v1325_v13, %v3473_v7  ;;  %v1374_v30 = vpop.f32.mrf.mxu1 }
 0x1fa   : > { %v1375_v17 = vadd.f32 %v1374_v30, %v3477_v4 }
 0x1fb   : > { %v1514_v47 = vpack.c.bf16 %v1470_v40, %v1421_v1 }
 0x1fc   : > { %v1517_v36 = vpack.c.bf16 %v1375_v17, %v1326_v48 }
 0x1fd   : > { %1578 = vst [vmem:[%s3324_s6 + $0x38] sm:$0xff] %v1514_v47 }
 0x1fe   : > { %1581 = vst [vmem:[%s3324_s6 + $0x50] sm:$0xff] %v1517_v36 }
 0x1ff   : > { %v1423_v53 = vpop.f32.mrf.mxu2 }
 0x200   : > { %v1424_v24 = vadd.f32 %v1423_v53, %v3484_v38  ;;  %v1472_v54 = vpop.f32.mrf.mxu3  ;;  %v1327_v25 = vpop.f32.mrf.mxu0 }
 0x201   : > { %v1473_v44 = vadd.f32 %v1472_v54, %v3488_v51  ;;  %v1328_v31 = vadd.f32 %v1327_v25, %v3473_v7  ;;  %v1376_v55 = vpop.f32.mrf.mxu1 }
 0x202   : > { %v1377_v35 = vadd.f32 %v1376_v55, %v3477_v4 }
 0x203   : > { %v1518_v21 = vpack.c.bf16 %v1473_v44, %v1424_v24 }
 0x204   : > { %v1521_v33 = vpack.c.bf16 %v1377_v35, %v1328_v31 }
 0x205   : > { %1582 = vst [vmem:[%s3324_s6 + $0x58] sm:$0xff] %v1518_v21 }
 0x206   : > { %1585 = vst [vmem:[%s3324_s6 + $0x70] sm:$0xff] %v1521_v33 }
 0x207   : > { %v1425_v3 = vpop.f32.mrf.mxu2 }
 0x208   : > { %v1426_v37 = vadd.f32 %v1425_v3, %v3484_v38  ;;  %v1474_v15 = vpop.f32.mrf.mxu3  ;;  %v1330_v18 = vpop.f32.mrf.mxu0 }
 0x209   : > { %v1475_v49 = vadd.f32 %v1474_v15, %v3488_v51  ;;  %v1331_v22 = vadd.f32 %v1330_v18, %v3473_v7  ;;  %v1379_v46 = vpop.f32.mrf.mxu1 }
 0x20a   : > { %v1380_v28 = vadd.f32 %v1379_v46, %v3477_v4 }
 0x20b   : > { %v1522_v58 = vpack.c.bf16 %v1475_v49, %v1426_v37 }
 0x20c   : > { %v1525_v41 = vpack.c.bf16 %v1380_v28, %v1331_v22 }
 0x20d   : > { %1586 = vst [vmem:[%s3324_s6 + $0x78] sm:$0xff] %v1522_v58 }
 0x20e   : > { %1589 = vst [vmem:[%s3324_s6 + $0x90] sm:$0xff] %v1525_v41 }
 0x20f   : > { %v1428_v14 = vpop.f32.mrf.mxu2 }
 0x210   : > { %v1429_v50 = vadd.f32 %v1428_v14, %v3484_v38  ;;  %v1477_v8 = vpop.f32.mrf.mxu3  ;;  %v1332_v63 = vpop.f32.mrf.mxu0 }
 0x211   : > { %v1478_v52 = vadd.f32 %v1477_v8, %v3488_v51  ;;  %v1333_v45 = vadd.f32 %v1332_v63, %v3473_v7  ;;  %v1381_v56 = vpop.f32.mrf.mxu1 }
 0x212   : > { %v1382_v34 = vadd.f32 %v1381_v56, %v3477_v4 }
 0x213   : > { %v1526_v6 = vpack.c.bf16 %v1478_v52, %v1429_v50 }
 0x214   : > { %v1529_v10 = vpack.c.bf16 %v1382_v34, %v1333_v45 }
 0x215   : > { %1590 = vst [vmem:[%s3324_s6 + $0x98] sm:$0xff] %v1526_v6 }
 0x216   : > { %1593 = vst [vmem:[%s3324_s6 + $0xb0] sm:$0xff] %v1529_v10 }
 0x217   : > { %v1430_v39 = vpop.f32.mrf.mxu2 }
 0x218   : > { %v1431_v59 = vadd.f32 %v1430_v39, %v3484_v38  ;;  %v1479_v60 = vpop.f32.mrf.mxu3  ;;  %v1335_v43 = vpop.f32.mrf.mxu0 }
 0x219   : > { %v1480_v57 = vadd.f32 %v1479_v60, %v3488_v51  ;;  %v1336_v2 = vadd.f32 %v1335_v43, %v3473_v7  ;;  %v1384_v61 = vpop.f32.mrf.mxu1 }
 0x21a   : > { %v1385_v62 = vadd.f32 %v1384_v61, %v3477_v4 }
 0x21b   : > { %v1530_v12 = vpack.c.bf16 %v1480_v57, %v1431_v59 }
 0x21c   : > { %v1533_v19 = vpack.c.bf16 %v1385_v62, %v1336_v2 }
 0x21d   : > { %1594 = vst [vmem:[%s3324_s6 + $0xb8] sm:$0xff] %v1530_v12 }
 0x21e   : > { %1597 = vst [vmem:[%s3324_s6 + $0xd0] sm:$0xff] %v1533_v19 }
 0x21f   : > { %v1433_v5 = vpop.f32.mrf.mxu2 }
 0x220   : > { %v1434_v29 = vadd.f32 %v1433_v5, %v3484_v38  ;;  %v1482_v42 = vpop.f32.mrf.mxu3  ;;  %v1337_v16 = vpop.f32.mrf.mxu0 }
 0x221   : > { %v1483_v20 = vadd.f32 %v1482_v42, %v3488_v51  ;;  %v1338_v11 = vadd.f32 %v1337_v16, %v3473_v7  ;;  %v1386_v0 = vpop.f32.mrf.mxu1 }
 0x222   : > { %v1387_v32 = vadd.f32 %v1386_v0, %v3477_v4 }
 0x223   : > { %v1534_v9 = vpack.c.bf16 %v1483_v20, %v1434_v29 }
 0x224   : > { %v1537_v26 = vpack.c.bf16 %v1387_v32, %v1338_v11 }
 0x225   : > { %1598 = vst [vmem:[%s3324_s6 + $0xd8] sm:$0xff] %v1534_v9 }
 0x226   : > { %1601 = vst [vmem:[%s3324_s6 + $0xf0] sm:$0xff] %v1537_v26 }
 0x227   : > { %v1435_v27 = vpop.f32.mrf.mxu2 }
 0x228   : > { %v1436_v1 = vadd.f32 %v1435_v27, %v3484_v38  ;;  %v1484_v23 = vpop.f32.mrf.mxu3  ;;  %v1340_v13 = vpop.f32.mrf.mxu0 }
 0x229   : > { %v1485_v40 = vadd.f32 %v1484_v23, %v3488_v51  ;;  %v1341_v48 = vadd.f32 %v1340_v13, %v3473_v7  ;;  %v1389_v30 = vpop.f32.mrf.mxu1 }
 0x22a   : > { %v1390_v17 = vadd.f32 %v1389_v30, %v3477_v4 }
 0x22b   : > { %v1538_v47 = vpack.c.bf16 %v1485_v40, %v1436_v1 }
 0x22c   : > { %v1541_v36 = vpack.c.bf16 %v1390_v17, %v1341_v48 }
 0x22d   : > { %1602 = vst [vmem:[%s3324_s6 + $0xf8] sm:$0xff] %v1538_v47 }
 0x22e   : > { %1605 = vst [vmem:[%s3324_s6 + $0x110] sm:$0xff] %v1541_v36 }
 0x22f   : > { %v1438_v53 = vpop.f32.mrf.mxu2 }
 0x230   : > { %v1439_v24 = vadd.f32 %v1438_v53, %v3484_v38  ;;  %v1487_v54 = vpop.f32.mrf.mxu3  ;;  %v1342_v25 = vpop.f32.mrf.mxu0 }
 0x231   : > { %v1488_v44 = vadd.f32 %v1487_v54, %v3488_v51  ;;  %v1343_v31 = vadd.f32 %v1342_v25, %v3473_v7  ;;  %v1391_v55 = vpop.f32.mrf.mxu1 }
 0x232   : > { %v1392_v35 = vadd.f32 %v1391_v55, %v3477_v4 }
 0x233   : > { %v1542_v21 = vpack.c.bf16 %v1488_v44, %v1439_v24 }
 0x234   : > { %v1545_v33 = vpack.c.bf16 %v1392_v35, %v1343_v31 }
 0x235   : > { %1606 = vst [vmem:[%s3324_s6 + $0x118] sm:$0xff] %v1542_v21 }
 0x236   : > { %1609 = vst [vmem:[%s3324_s6 + $0x130] sm:$0xff] %v1545_v33 }
 0x237   : > { %v1440_v3 = vpop.f32.mrf.mxu2 }
 0x238   : > { %v1441_v37 = vadd.f32 %v1440_v3, %v3484_v38  ;;  %v1489_v15 = vpop.f32.mrf.mxu3  ;;  %v1345_v18 = vpop.f32.mrf.mxu0 }
 0x239   : > { %v1490_v49 = vadd.f32 %v1489_v15, %v3488_v51  ;;  %v1346_v22 = vadd.f32 %v1345_v18, %v3473_v7  ;;  %v1394_v46 = vpop.f32.mrf.mxu1 }
 0x23a   : > { %v1395_v28 = vadd.f32 %v1394_v46, %v3477_v4 }
 0x23b   : > { %v1546_v58 = vpack.c.bf16 %v1490_v49, %v1441_v37 }
 0x23c   : > { %v1549_v41 = vpack.c.bf16 %v1395_v28, %v1346_v22 }
 0x23d   : > { %1610 = vst [vmem:[%s3324_s6 + $0x138] sm:$0xff] %v1546_v58 }
 0x23e   : > { %1613 = vst [vmem:[%s3324_s6 + $0x150] sm:$0xff] %v1549_v41 }
 0x23f   : > { %v1443_v14 = vpop.f32.mrf.mxu2 }
 0x240   : > { %v1444_v50 = vadd.f32 %v1443_v14, %v3484_v38  ;;  %v1492_v8 = vpop.f32.mrf.mxu3  ;;  %v1347_v63 = vpop.f32.mrf.mxu0 }
 0x241   : > { %v1493_v52 = vadd.f32 %v1492_v8, %v3488_v51  ;;  %v1348_v45 = vadd.f32 %v1347_v63, %v3473_v7  ;;  %v1396_v56 = vpop.f32.mrf.mxu1 }
 0x242   : > { %v1397_v34 = vadd.f32 %v1396_v56, %v3477_v4 }
 0x243   : > { %v1550_v6 = vpack.c.bf16 %v1493_v52, %v1444_v50 }
 0x244   : > { %v1553_v10 = vpack.c.bf16 %v1397_v34, %v1348_v45 }
 0x245   : > { %1614 = vst [vmem:[%s3324_s6 + $0x158] sm:$0xff] %v1550_v6 }
 0x246   : > { %1617 = vst [vmem:[%s3324_s6 + $0x170] sm:$0xff] %v1553_v10 }
 0x247   : > { %v1445_v39 = vpop.f32.mrf.mxu2 }
 0x248   : > { %v1446_v59 = vadd.f32 %v1445_v39, %v3484_v38  ;;  %v1494_v60 = vpop.f32.mrf.mxu3  ;;  %v1350_v43 = vpop.f32.mrf.mxu0 }
 0x249   : > { %v1495_v57 = vadd.f32 %v1494_v60, %v3488_v51  ;;  %v1351_v2 = vadd.f32 %v1350_v43, %v3473_v7  ;;  %v1399_v61 = vpop.f32.mrf.mxu1 }
 0x24a   : > { %v1400_v62 = vadd.f32 %v1399_v61, %v3477_v4 }
 0x24b   : > { %v1554_v12 = vpack.c.bf16 %v1495_v57, %v1446_v59 }
 0x24c   : > { %v1557_v19 = vpack.c.bf16 %v1400_v62, %v1351_v2 }
 0x24d   : > { %1618 = vst [vmem:[%s3324_s6 + $0x178] sm:$0xff] %v1554_v12 }
 0x24e   : > { %1621 = vst [vmem:[%s3324_s6 + $0x190] sm:$0xff] %v1557_v19 }
 0x24f   : > { %v1448_v5 = vpop.f32.mrf.mxu2 }
 0x250   : > { %v1449_v29 = vadd.f32 %v1448_v5, %v3484_v38  ;;  %v1497_v42 = vpop.f32.mrf.mxu3  ;;  %v1352_v16 = vpop.f32.mrf.mxu0 }
 0x251   : > { %v1498_v20 = vadd.f32 %v1497_v42, %v3488_v51  ;;  %v1353_v11 = vadd.f32 %v1352_v16, %v3473_v7  ;;  %v1401_v0 = vpop.f32.mrf.mxu1 }
 0x252   : > { %v1402_v32 = vadd.f32 %v1401_v0, %v3477_v4 }
 0x253   : > { %v1558_v9 = vpack.c.bf16 %v1498_v20, %v1449_v29 }
 0x254   : > { %v1561_v26 = vpack.c.bf16 %v1402_v32, %v1353_v11 }
 0x255   : > { %1622 = vst [vmem:[%s3324_s6 + $0x198] sm:$0xff] %v1558_v9 }
 0x256   : > { %1625 = vst [vmem:[%s3324_s6 + $0x1b0] sm:$0xff] %v1561_v26 }
 0x257   : > { %v1450_v27 = vpop.f32.mrf.mxu2 }
 0x258   : > { %v1451_v1 = vadd.f32 %v1450_v27, %v3484_v38  ;;  %v1499_v23 = vpop.f32.mrf.mxu3  ;;  %v1355_v13 = vpop.f32.mrf.mxu0 }
 0x259   : > { %v1500_v40 = vadd.f32 %v1499_v23, %v3488_v51  ;;  %v1356_v48 = vadd.f32 %v1355_v13, %v3473_v7  ;;  %v1404_v30 = vpop.f32.mrf.mxu1 }
 0x25a   : > { %v1405_v17 = vadd.f32 %v1404_v30, %v3477_v4 }
 0x25b   : > { %v1562_v47 = vpack.c.bf16 %v1500_v40, %v1451_v1 }
 0x25c   : > { %v1565_v36 = vpack.c.bf16 %v1405_v17, %v1356_v48 }
 0x25d   : > { %1626 = vst [vmem:[%s3324_s6 + $0x1b8] sm:$0xff] %v1562_v47 }
 0x25e   : > { %1629 = vst [vmem:[%s3324_s6 + $0x1d0] sm:$0xff] %v1565_v36 }
 0x25f   : > { %v1453_v53 = vpop.f32.mrf.mxu2 }
 0x260   : > { %v1454_v24 = vadd.f32 %v1453_v53, %v3484_v38  ;;  %v1502_v54 = vpop.f32.mrf.mxu3  ;;  %v1357_v25 = vpop.f32.mrf.mxu0 }
 0x261   : > { %v1503_v44 = vadd.f32 %v1502_v54, %v3488_v51  ;;  %v1358_v31 = vadd.f32 %v1357_v25, %v3473_v7  ;;  %v1406_v55 = vpop.f32.mrf.mxu1 }
 0x262   : > { %v1407_v35 = vadd.f32 %v1406_v55, %v3477_v4 }
 0x263   : > { %v1566_v21 = vpack.c.bf16 %v1503_v44, %v1454_v24 }
 0x264   : > { %v1569_v33 = vpack.c.bf16 %v1407_v35, %v1358_v31 }
 0x265   : > { %1630 = vst [vmem:[%s3324_s6 + $0x1d8] sm:$0xff] %v1566_v21 }
 0x266   : > { %1633 = vst [vmem:[%s3324_s6 + $0x1f0] sm:$0xff] %v1569_v33 }
 0x267   : > { %v1455_v3 = vpop.f32.mrf.mxu2 }
 0x268   : > { %v1456_v7 = vadd.f32 %v1455_v3, %v3484_v38  ;;  %v1504_v37 = vpop.f32.mrf.mxu3 }
 0x269   : > { %v1505_v15 = vadd.f32 %v1504_v37, %v3488_v51 }
 0x26b   : > { %v1570_v4 = vpack.c.bf16 %v1505_v15, %v1456_v7 }
 0x26d   : > { %1634 = vst [vmem:[%s3324_s6 + $0x1f8] sm:$0xff] %v1570_v4 }
 0x26e   : > { %2176 = shalt.err (!%p2173_p5)
}
 0x26f   : > { %s2229_s30 = smov 512   ;;  %s2230_s4 = smov 32  }
 0x270   : > { %2022 = dma.vmem_to_hbm [thread:$0]  (%p2291_p4), %s1652_s11, 8192, %s1654_s18, %s1636_s15, %s2229_s30, %s2229_s30, %s2230_s4  }
 0x271 PF: > { %p2028_p6 = scmp.ge.s32.totalorder %s2227_s17, 2  ;;  %s1668_s5 = sand.u32 1, %s2207_s12  }
 0x272   : > { %s1669_s6 = scalar_lea.sflag [#allocation4], %s1668_s5 }
 0x273   : > { %p2025_p7 = pnand %p2028_p6, %p2298_p8 }
 0x275   : > { %p2026_p9 = pneg %p2025_p7 }
 0x277   : > { %2202 = dma.done.wait (%p2026_p9), %s1669_s6, 8192  }
 0x278   : > { %2204 = vsyncadd (%p2026_p9), %s1669_s6, 4294959104  ;;  %s16_s17 = sadd.s32 1, %s2227_s17   ;;  %s3732_s12 = smov %s2211_s13 }
 0x279   : > { %p13_p10 = scmp.ge.s32.totalorder %s16_s17, 4   ;;  %s3733_s13 = smov %s2215_s14 }
 0x27a   : > { %s3734_s14 = smov %s2304_s25  ;;  %s3735_s15 = smov %s2223_s16 }
 0x27b   : > { %s3736_s16 = smov %s3738_s20  ;;  %15 = sbr.rel (!%p13_p10) target bundleno = 4 (0x4), region = 75 }
 0x280   :  { %1675 = vsyncpa [#allocation4], 1 }
 0x281   :  { %1677 = vsyncpa [#allocation4 + $0x1], 1 }

</bundles_post_ra>
